<compile_context>
chip_gen: v7x
topology: tpu7x:2x2x1
jax: 0.10.0
libtpu: 0.0.40
codegen_flags: <defaults>
</compile_context>

<pallas_src>
import jax
import jax.numpy as jnp
from jax.experimental import pallas as pl
from jax.experimental.pallas import tpu as pltpu


def _round_up(x: int, m: int) -> int:
    return ((x + m - 1) // m) * m


# ---------------------------------------------------------------------------
# Path A: table fits in VMEM -> resident table, in-kernel row gather.
# ---------------------------------------------------------------------------
def _make_vmem_gather_kernel(T_pad: int):
    def kernel(tok_ref, emb_ref, pos_ref, out_ref):
        # tok_ref: (B*T_pad,) int32 in SMEM (scalar-prefetched, flattened)
        # emb_ref: (V, E)   VMEM-resident token-embedding table
        # pos_ref: (T_pad, E) VMEM-resident positional table
        # out_ref: (T_pad, E) output tile for batch row b (batch dim squeezed)
        b = pl.program_id(0)
        base = b * T_pad
        for r in range(T_pad):  # static unroll; CLIP-sized T (~80 rows)
            tid = tok_ref[base + r]
            row = emb_ref[pl.ds(tid, 1), :] + pos_ref[pl.ds(r, 1), :]
            out_ref[pl.ds(r, 1), :] = row.astype(out_ref.dtype)

    return kernel


# ---------------------------------------------------------------------------
# Path B: table stays in HBM -> deep-pipelined manual row-gather DMAs.
# ---------------------------------------------------------------------------
def _make_hbm_gather_kernel(TQ: int, NBUF: int, LOOKAHEAD: int, total: int):
    def kernel(tok_ref, pos_ref, emb_hbm, out_ref, gather_buf, sems):
        # tok_ref:    (B*T_pad,) int32 in SMEM (scalar-prefetched, flattened)
        # pos_ref:    (TQ, E)     positional tile for this step
        # emb_hbm:    (V, E)      embedding table left in HBM (pl.ANY)
        # out_ref:    (TQ, E)     output tile (flat row-tile index i)
        # gather_buf: (NBUF, TQ, E) multi-buffered VMEM gather scratch
        # sems:       (NBUF,)     one DMA semaphore per buffer slot
        i = pl.program_id(0)

        def start_gather(tile, slot):
            base = tile * TQ  # flat row base: T_pad == NT*TQ so this is exact
            for r in range(TQ):  # TQ is static -> fully unrolled DMA issues
                tid = tok_ref[base + r]
                pltpu.make_async_copy(
                    emb_hbm.at[pl.ds(tid, 1), :],
                    gather_buf.at[slot, pl.ds(r, 1), :],
                    sems.at[slot],
                ).start()

        # Prime the pipeline once (flat grid -> no per-batch-row re-prime).
        @pl.when(i == 0)
        def _():
            for d in range(LOOKAHEAD):
                start_gather(d, d % NBUF)

        # Keep tiles i .. i+LOOKAHEAD in flight (crosses batch-row boundaries).
        @pl.when(i + LOOKAHEAD < total)
        def _():
            start_gather(i + LOOKAHEAD, (i + LOOKAHEAD) % NBUF)

        slot = i % NBUF
        # Wait for this tile's TQ row copies.  All TQ copies signaled
        # sems[slot]; each wait descriptor below has the SAME (1, E) shape as
        # the started copies, so the per-copy signal amounts match exactly.
        for r in range(TQ):
            pltpu.make_async_copy(
                emb_hbm.at[pl.ds(0, 1), :],  # shape-only dummy src: (1, E)
                gather_buf.at[slot, pl.ds(r, 1), :],
                sems.at[slot],
            ).wait()

        out_ref[...] = (gather_buf[slot] + pos_ref[...]).astype(out_ref.dtype)

    return kernel


def clip_embedding(
    tokens,
    token_embedding,
    positional_embedding,
    *,
    vmem_table_limit_bytes=8 * 1024 * 1024,
    tile_rows=256,
    force_hbm_gather=False,
):
    """tokens: (B, T) int; token_embedding: (V, E); positional_embedding: (T, E)."""
    B, T = tokens.shape
    V, E = token_embedding.shape
    assert positional_embedding.shape == (T, E)

    out_dtype = jnp.result_type(token_embedding.dtype, positional_embedding.dtype)
    pos = positional_embedding.astype(out_dtype)

    # Clamp ids: an out-of-range id would otherwise drive an OOB gather.
    toks = jnp.clip(tokens.astype(jnp.int32), 0, V - 1)

    table_bytes = V * E * jnp.dtype(token_embedding.dtype).itemsize
    use_vmem_table = (not force_hbm_gather) and table_bytes <= vmem_table_limit_bytes

    if use_vmem_table:
        TQ = _round_up(T, 8)  # whole (padded) sequence per grid step
        NT = 1
    else:
        cap = max(8, (tile_rows // 8) * 8)
        TQ = min(_round_up(T, 8), cap)
        NT = -(-T // TQ)
    T_pad = NT * TQ

    if T_pad != T:
        toks = jnp.pad(toks, ((0, 0), (0, T_pad - T)))
        pos = jnp.pad(pos, ((0, T_pad - T), (0, 0)))
    toks_flat = toks.reshape(-1)  # 1-D SMEM layout avoids 2-D SMEM padding blowup

    # Pure memory traffic, no MXU work: tell XLA so it can overlap neighbors.
    bytes_accessed = int(
        toks_flat.size * 4
        + pos.size * jnp.dtype(pos.dtype).itemsize
        + B * T_pad * E * jnp.dtype(token_embedding.dtype).itemsize
        + B * T_pad * E * jnp.dtype(out_dtype).itemsize
    )
    cost = pl.CostEstimate(
        flops=int(B * T_pad * E), transcendentals=0, bytes_accessed=bytes_accessed
    )

    if use_vmem_table:
        grid_spec = pltpu.PrefetchScalarGridSpec(
            num_scalar_prefetch=1,
            grid=(B,),
            in_specs=[
                # Both tables: constant block index -> DMA'd once, VMEM-resident.
                pl.BlockSpec((V, E), lambda b, toks: (0, 0)),
                pl.BlockSpec((T_pad, E), lambda b, toks: (0, 0)),
            ],
            out_specs=pl.BlockSpec(
                (pl.Squeezed(), T_pad, E), lambda b, toks: (b, 0, 0)
            ),
        )
        out = pl.pallas_call(
            _make_vmem_gather_kernel(T_pad),
            out_shape=jax.ShapeDtypeStruct((B, T_pad, E), out_dtype),
            grid_spec=grid_spec,
            compiler_params=pltpu.CompilerParams(dimension_semantics=("parallel",)),
            cost_estimate=cost,
        )(toks_flat, token_embedding, pos)
    else:
        total = B * NT
        NBUF = min(4, total)      # gather-pipeline depth
        LOOKAHEAD = NBUF - 1      # tiles prefetched ahead of the current one

        if NT == 1:
            pos_map = lambda i, toks: (0, 0)          # resident, DMA'd once
        else:
            pos_map = lambda i, toks: (i % NT, 0)

        grid_spec = pltpu.PrefetchScalarGridSpec(
            num_scalar_prefetch=1,
            grid=(total,),  # flat over B*NT row tiles: no per-batch re-prime
            in_specs=[
                pl.BlockSpec((TQ, E), pos_map),
                # Embedding table stays in HBM; rows gathered manually.
                pl.BlockSpec(memory_space=pl.ANY),
            ],
            out_specs=pl.BlockSpec((TQ, E), lambda i, toks: (i, 0)),
            scratch_shapes=[
                pltpu.VMEM((NBUF, TQ, E), token_embedding.dtype),
                pltpu.SemaphoreType.DMA((NBUF,)),
            ],
        )
        out = pl.pallas_call(
            _make_hbm_gather_kernel(TQ, NBUF, LOOKAHEAD, total),
            out_shape=jax.ShapeDtypeStruct((B * T_pad, E), out_dtype),
            grid_spec=grid_spec,
            compiler_params=pltpu.CompilerParams(
                # Flat tile axis carries the multi-buffer ordering -> arbitrary.
                dimension_semantics=("arbitrary",),
            ),
            cost_estimate=cost,
        )(toks_flat, pos, token_embedding)
        out = out.reshape(B, T_pad, E)

    if T_pad != T:
        out = out[:, :T, :]
    return out


if __name__ == "__main__":
    # Small shapes consistent with the module's forward: E lane-aligned, T = 77
    # (CLIP-like, exercises the pad-to-80 + slice path) at a small vocab.
    n_vocab, n_embed, n_tokens, batch = 512, 128, 77, 2

    key = jax.random.PRNGKey(0)
    k_emb, k_pos, k_tok = jax.random.split(key, 3)

    token_embedding = jax.random.normal(k_emb, (n_vocab, n_embed), dtype=jnp.float32)
    positional_embedding = 0.01 * jax.random.normal(
        k_pos, (n_tokens, n_embed), dtype=jnp.float32
    )
    tokens = jax.random.randint(k_tok, (batch, n_tokens), 0, n_vocab, dtype=jnp.int32)

    # Pure-JAX reference.
    ref = jnp.take(token_embedding, tokens, axis=0) + positional_embedding[None, :, :]

    # Path A: small table -> VMEM-resident table, in-kernel gather.
    out_vmem = jax.block_until_ready(
        clip_embedding(tokens, token_embedding, positional_embedding)
    )
    assert out_vmem.shape == (batch, n_tokens, n_embed)
    assert jnp.allclose(out_vmem, ref, atol=1e-6), "VMEM-path mismatch vs reference"

    # Path B: force the HBM row-gather path (used for real CLIP vocab sizes).
    out_hbm = jax.block_until_ready(
        clip_embedding(
            tokens, token_embedding, positional_embedding, force_hbm_gather=True
        )
    )
    assert out_hbm.shape == (batch, n_tokens, n_embed)
    assert jnp.allclose(out_hbm, ref, atol=1e-6), "HBM-path mismatch vs reference"

    print("KERNEL_OK")
</pallas_src>

<mosaic_0001>
module attributes {stable_mosaic.version = 11 : i64} {
  func.func @kernel(%arg0: i32, %arg1: memref<160xi32, #tpu.memory_space<smem>>, %arg2: memref<512x128xf32, #tpu.memory_space<vmem>>, %arg3: memref<80x128xf32, #tpu.memory_space<vmem>>, %arg4: memref<1x80x128xf32, #tpu.memory_space<vmem>>) attributes {dimension_semantics = [#tpu.dimension_semantics<parallel>], iteration_bounds = array<i64: 2>, scalar_prefetch = 1 : i64, scratch_operands = 0 : i64, tpu.core_type = #tpu.core_type<tc>, window_params = [{pipeline_mode = #tpu.pipeline_mode<synchronous>, transform_indices = @transform_0, window_bounds = array<i64: 512, 128>}, {pipeline_mode = #tpu.pipeline_mode<synchronous>, transform_indices = @transform_1, window_bounds = array<i64: 80, 128>}, {transform_indices = @transform_2, window_bounds = array<i64: 1, 80, 128>}]} {
    %c80_i32 = arith.constant 80 : i32
    %0 = arith.muli %arg0, %c80_i32 : i32
    %c0_i32 = arith.constant 0 : i32
    %1 = arith.addi %0, %c0_i32 : i32
    %2 = arith.index_cast %1 : i32 to index
    %3 = memref.load %arg1[%2] : memref<160xi32, #tpu.memory_space<smem>>
    %4 = arith.index_cast %3 : i32 to index
    %c0 = arith.constant 0 : index
    %5 = vector.load %arg2[%4, %c0] : memref<512x128xf32, #tpu.memory_space<vmem>>, vector<1x128xf32>
    %c0_0 = arith.constant 0 : index
    %c0_1 = arith.constant 0 : index
    %6 = vector.load %arg3[%c0_0, %c0_1] : memref<80x128xf32, #tpu.memory_space<vmem>>, vector<1x128xf32>
    %7 = arith.addf %5, %6 : vector<1x128xf32>
    %c0_2 = arith.constant 0 : index
    %c0_3 = arith.constant 0 : index
    %c0_4 = arith.constant 0 : index
    %8 = vector.load %arg4[%c0_2, %c0_3, %c0_4] : memref<1x80x128xf32, #tpu.memory_space<vmem>>, vector<1x1x128xf32>
    %9 = vector.shape_cast %8 : vector<1x1x128xf32> to vector<1x128xf32>
    %10 = vector.shape_cast %7 : vector<1x128xf32> to vector<1x1x128xf32>
    tpu.vector_store %arg4[%c0_2, %c0_3, %c0_4], %10 {strides = array<i32>} : memref<1x80x128xf32, #tpu.memory_space<vmem>>, vector<1x1x128xf32>,
    %c1_i32 = arith.constant 1 : i32
    %11 = arith.addi %0, %c1_i32 : i32
    %12 = arith.index_cast %11 : i32 to index
    %13 = memref.load %arg1[%12] : memref<160xi32, #tpu.memory_space<smem>>
    %14 = arith.index_cast %13 : i32 to index
    %c0_5 = arith.constant 0 : index
    %15 = vector.load %arg2[%14, %c0_5] : memref<512x128xf32, #tpu.memory_space<vmem>>, vector<1x128xf32>
    %c1 = arith.constant 1 : index
    %c0_6 = arith.constant 0 : index
    %16 = vector.load %arg3[%c1, %c0_6] : memref<80x128xf32, #tpu.memory_space<vmem>>, vector<1x128xf32>
    %17 = arith.addf %15, %16 : vector<1x128xf32>
    %c0_7 = arith.constant 0 : index
    %c1_8 = arith.constant 1 : index
    %c0_9 = arith.constant 0 : index
    %18 = vector.load %arg4[%c0_7, %c1_8, %c0_9] : memref<1x80x128xf32, #tpu.memory_space<vmem>>, vector<1x1x128xf32>
    %19 = vector.shape_cast %18 : vector<1x1x128xf32> to vector<1x128xf32>
    %20 = vector.shape_cast %17 : vector<1x128xf32> to vector<1x1x128xf32>
    tpu.vector_store %arg4[%c0_7, %c1_8, %c0_9], %20 {strides = array<i32>} : memref<1x80x128xf32, #tpu.memory_space<vmem>>, vector<1x1x128xf32>,
    %c2_i32 = arith.constant 2 : i32
    %21 = arith.addi %0, %c2_i32 : i32
    %22 = arith.index_cast %21 : i32 to index
    %23 = memref.load %arg1[%22] : memref<160xi32, #tpu.memory_space<smem>>
    %24 = arith.index_cast %23 : i32 to index
    %c0_10 = arith.constant 0 : index
    %25 = vector.load %arg2[%24, %c0_10] : memref<512x128xf32, #tpu.memory_space<vmem>>, vector<1x128xf32>
    %c2 = arith.constant 2 : index
    %c0_11 = arith.constant 0 : index
    %26 = vector.load %arg3[%c2, %c0_11] : memref<80x128xf32, #tpu.memory_space<vmem>>, vector<1x128xf32>
    %27 = arith.addf %25, %26 : vector<1x128xf32>
    %c0_12 = arith.constant 0 : index
    %c2_13 = arith.constant 2 : index
    %c0_14 = arith.constant 0 : index
    %28 = vector.load %arg4[%c0_12, %c2_13, %c0_14] : memref<1x80x128xf32, #tpu.memory_space<vmem>>, vector<1x1x128xf32>
    %29 = vector.shape_cast %28 : vector<1x1x128xf32> to vector<1x128xf32>
    %30 = vector.shape_cast %27 : vector<1x128xf32> to vector<1x1x128xf32>
    tpu.vector_store %arg4[%c0_12, %c2_13, %c0_14], %30 {strides = array<i32>} : memref<1x80x128xf32, #tpu.memory_space<vmem>>, vector<1x1x128xf32>,
    %c3_i32 = arith.constant 3 : i32
    %31 = arith.addi %0, %c3_i32 : i32
    %32 = arith.index_cast %31 : i32 to index
    %33 = memref.load %arg1[%32] : memref<160xi32, #tpu.memory_space<smem>>
    %34 = arith.index_cast %33 : i32 to index
    %c0_15 = arith.constant 0 : index
    %35 = vector.load %arg2[%34, %c0_15] : memref<512x128xf32, #tpu.memory_space<vmem>>, vector<1x128xf32>
    %c3 = arith.constant 3 : index
    %c0_16 = arith.constant 0 : index
    %36 = vector.load %arg3[%c3, %c0_16] : memref<80x128xf32, #tpu.memory_space<vmem>>, vector<1x128xf32>
    %37 = arith.addf %35, %36 : vector<1x128xf32>
    %c0_17 = arith.constant 0 : index
    %c3_18 = arith.constant 3 : index
    %c0_19 = arith.constant 0 : index
    %38 = vector.load %arg4[%c0_17, %c3_18, %c0_19] : memref<1x80x128xf32, #tpu.memory_space<vmem>>, vector<1x1x128xf32>
    %39 = vector.shape_cast %38 : vector<1x1x128xf32> to vector<1x128xf32>
    %40 = vector.shape_cast %37 : vector<1x128xf32> to vector<1x1x128xf32>
    tpu.vector_store %arg4[%c0_17, %c3_18, %c0_19], %40 {strides = array<i32>} : memref<1x80x128xf32, #tpu.memory_space<vmem>>, vector<1x1x128xf32>,
    %c4_i32 = arith.constant 4 : i32
    %41 = arith.addi %0, %c4_i32 : i32
    %42 = arith.index_cast %41 : i32 to index
    %43 = memref.load %arg1[%42] : memref<160xi32, #tpu.memory_space<smem>>
    %44 = arith.index_cast %43 : i32 to index
    %c0_20 = arith.constant 0 : index
    %45 = vector.load %arg2[%44, %c0_20] : memref<512x128xf32, #tpu.memory_space<vmem>>, vector<1x128xf32>
    %c4 = arith.constant 4 : index
    %c0_21 = arith.constant 0 : index
    %46 = vector.load %arg3[%c4, %c0_21] : memref<80x128xf32, #tpu.memory_space<vmem>>, vector<1x128xf32>
    %47 = arith.addf %45, %46 : vector<1x128xf32>
    %c0_22 = arith.constant 0 : index
    %c4_23 = arith.constant 4 : index
    %c0_24 = arith.constant 0 : index
    %48 = vector.load %arg4[%c0_22, %c4_23, %c0_24] : memref<1x80x128xf32, #tpu.memory_space<vmem>>, vector<1x1x128xf32>
    %49 = vector.shape_cast %48 : vector<1x1x128xf32> to vector<1x128xf32>
    %50 = vector.shape_cast %47 : vector<1x128xf32> to vector<1x1x128xf32>
    tpu.vector_store %arg4[%c0_22, %c4_23, %c0_24], %50 {strides = array<i32>} : memref<1x80x128xf32, #tpu.memory_space<vmem>>, vector<1x1x128xf32>,
    %c5_i32 = arith.constant 5 : i32
    %51 = arith.addi %0, %c5_i32 : i32
    %52 = arith.index_cast %51 : i32 to index
    %53 = memref.load %arg1[%52] : memref<160xi32, #tpu.memory_space<smem>>
    %54 = arith.index_cast %53 : i32 to index
    %c0_25 = arith.constant 0 : index
    %55 = vector.load %arg2[%54, %c0_25] : memref<512x128xf32, #tpu.memory_space<vmem>>, vector<1x128xf32>
    %c5 = arith.constant 5 : index
    %c0_26 = arith.constant 0 : index
    %56 = vector.load %arg3[%c5, %c0_26] : memref<80x128xf32, #tpu.memory_space<vmem>>, vector<1x128xf32>
    %57 = arith.addf %55, %56 : vector<1x128xf32>
    %c0_27 = arith.constant 0 : index
    %c5_28 = arith.constant 5 : index
    %c0_29 = arith.constant 0 : index
    %58 = vector.load %arg4[%c0_27, %c5_28, %c0_29] : memref<1x80x128xf32, #tpu.memory_space<vmem>>, vector<1x1x128xf32>
    %59 = vector.shape_cast %58 : vector<1x1x128xf32> to vector<1x128xf32>
    %60 = vector.shape_cast %57 : vector<1x128xf32> to vector<1x1x128xf32>
    tpu.vector_store %arg4[%c0_27, %c5_28, %c0_29], %60 {strides = array<i32>} : memref<1x80x128xf32, #tpu.memory_space<vmem>>, vector<1x1x128xf32>,
    %c6_i32 = arith.constant 6 : i32
    %61 = arith.addi %0, %c6_i32 : i32
    %62 = arith.index_cast %61 : i32 to index
    %63 = memref.load %arg1[%62] : memref<160xi32, #tpu.memory_space<smem>>
    %64 = arith.index_cast %63 : i32 to index
    %c0_30 = arith.constant 0 : index
    %65 = vector.load %arg2[%64, %c0_30] : memref<512x128xf32, #tpu.memory_space<vmem>>, vector<1x128xf32>
    %c6 = arith.constant 6 : index
    %c0_31 = arith.constant 0 : index
    %66 = vector.load %arg3[%c6, %c0_31] : memref<80x128xf32, #tpu.memory_space<vmem>>, vector<1x128xf32>
    %67 = arith.addf %65, %66 : vector<1x128xf32>
    %c0_32 = arith.constant 0 : index
    %c6_33 = arith.constant 6 : index
    %c0_34 = arith.constant 0 : index
    %68 = vector.load %arg4[%c0_32, %c6_33, %c0_34] : memref<1x80x128xf32, #tpu.memory_space<vmem>>, vector<1x1x128xf32>
    %69 = vector.shape_cast %68 : vector<1x1x128xf32> to vector<1x128xf32>
    %70 = vector.shape_cast %67 : vector<1x128xf32> to vector<1x1x128xf32>
    tpu.vector_store %arg4[%c0_32, %c6_33, %c0_34], %70 {strides = array<i32>} : memref<1x80x128xf32, #tpu.memory_space<vmem>>, vector<1x1x128xf32>,
    %c7_i32 = arith.constant 7 : i32
    %71 = arith.addi %0, %c7_i32 : i32
    %72 = arith.index_cast %71 : i32 to index
    %73 = memref.load %arg1[%72] : memref<160xi32, #tpu.memory_space<smem>>
    %74 = arith.index_cast %73 : i32 to index
    %c0_35 = arith.constant 0 : index
    %75 = vector.load %arg2[%74, %c0_35] : memref<512x128xf32, #tpu.memory_space<vmem>>, vector<1x128xf32>
    %c7 = arith.constant 7 : index
    %c0_36 = arith.constant 0 : index
    %76 = vector.load %arg3[%c7, %c0_36] : memref<80x128xf32, #tpu.memory_space<vmem>>, vector<1x128xf32>
    %77 = arith.addf %75, %76 : vector<1x128xf32>
    %c0_37 = arith.constant 0 : index
    %c7_38 = arith.constant 7 : index
    %c0_39 = arith.constant 0 : index
    %78 = vector.load %arg4[%c0_37, %c7_38, %c0_39] : memref<1x80x128xf32, #tpu.memory_space<vmem>>, vector<1x1x128xf32>
    %79 = vector.shape_cast %78 : vector<1x1x128xf32> to vector<1x128xf32>
    %80 = vector.shape_cast %77 : vector<1x128xf32> to vector<1x1x128xf32>
    tpu.vector_store %arg4[%c0_37, %c7_38, %c0_39], %80 {strides = array<i32>} : memref<1x80x128xf32, #tpu.memory_space<vmem>>, vector<1x1x128xf32>,
    %c8_i32 = arith.constant 8 : i32
    %81 = arith.addi %0, %c8_i32 : i32
    %82 = arith.index_cast %81 : i32 to index
    %83 = memref.load %arg1[%82] : memref<160xi32, #tpu.memory_space<smem>>
    %84 = arith.index_cast %83 : i32 to index
    %c0_40 = arith.constant 0 : index
    %85 = vector.load %arg2[%84, %c0_40] : memref<512x128xf32, #tpu.memory_space<vmem>>, vector<1x128xf32>
    %c8 = arith.constant 8 : index
    %c0_41 = arith.constant 0 : index
    %86 = vector.load %arg3[%c8, %c0_41] : memref<80x128xf32, #tpu.memory_space<vmem>>, vector<1x128xf32>
    %87 = arith.addf %85, %86 : vector<1x128xf32>
    %c0_42 = arith.constant 0 : index
    %c8_43 = arith.constant 8 : index
    %c0_44 = arith.constant 0 : index
    %88 = vector.load %arg4[%c0_42, %c8_43, %c0_44] : memref<1x80x128xf32, #tpu.memory_space<vmem>>, vector<1x1x128xf32>
    %89 = vector.shape_cast %88 : vector<1x1x128xf32> to vector<1x128xf32>
    %90 = vector.shape_cast %87 : vector<1x128xf32> to vector<1x1x128xf32>
    tpu.vector_store %arg4[%c0_42, %c8_43, %c0_44], %90 {strides = array<i32>} : memref<1x80x128xf32, #tpu.memory_space<vmem>>, vector<1x1x128xf32>,
    %c9_i32 = arith.constant 9 : i32
    %91 = arith.addi %0, %c9_i32 : i32
    %92 = arith.index_cast %91 : i32 to index
    %93 = memref.load %arg1[%92] : memref<160xi32, #tpu.memory_space<smem>>
    %94 = arith.index_cast %93 : i32 to index
    %c0_45 = arith.constant 0 : index
    %95 = vector.load %arg2[%94, %c0_45] : memref<512x128xf32, #tpu.memory_space<vmem>>, vector<1x128xf32>
    %c9 = arith.constant 9 : index
    %c0_46 = arith.constant 0 : index
    %96 = vector.load %arg3[%c9, %c0_46] : memref<80x128xf32, #tpu.memory_space<vmem>>, vector<1x128xf32>
    %97 = arith.addf %95, %96 : vector<1x128xf32>
    %c0_47 = arith.constant 0 : index
    %c9_48 = arith.constant 9 : index
    %c0_49 = arith.constant 0 : index
    %98 = vector.load %arg4[%c0_47, %c9_48, %c0_49] : memref<1x80x128xf32, #tpu.memory_space<vmem>>, vector<1x1x128xf32>
    %99 = vector.shape_cast %98 : vector<1x1x128xf32> to vector<1x128xf32>
    %100 = vector.shape_cast %97 : vector<1x128xf32> to vector<1x1x128xf32>
    tpu.vector_store %arg4[%c0_47, %c9_48, %c0_49], %100 {strides = array<i32>} : memref<1x80x128xf32, #tpu.memory_space<vmem>>, vector<1x1x128xf32>,
    %c10_i32 = arith.constant 10 : i32
    %101 = arith.addi %0, %c10_i32 : i32
    %102 = arith.index_cast %101 : i32 to index
    %103 = memref.load %arg1[%102] : memref<160xi32, #tpu.memory_space<smem>>
    %104 = arith.index_cast %103 : i32 to index
    %c0_50 = arith.constant 0 : index
    %105 = vector.load %arg2[%104, %c0_50] : memref<512x128xf32, #tpu.memory_space<vmem>>, vector<1x128xf32>
    %c10 = arith.constant 10 : index
    %c0_51 = arith.constant 0 : index
    %106 = vector.load %arg3[%c10, %c0_51] : memref<80x128xf32, #tpu.memory_space<vmem>>, vector<1x128xf32>
    %107 = arith.addf %105, %106 : vector<1x128xf32>
    %c0_52 = arith.constant 0 : index
    %c10_53 = arith.constant 10 : index
    %c0_54 = arith.constant 0 : index
    %108 = vector.load %arg4[%c0_52, %c10_53, %c0_54] : memref<1x80x128xf32, #tpu.memory_space<vmem>>, vector<1x1x128xf32>
    %109 = vector.shape_cast %108 : vector<1x1x128xf32> to vector<1x128xf32>
    %110 = vector.shape_cast %107 : vector<1x128xf32> to vector<1x1x128xf32>
    tpu.vector_store %arg4[%c0_52, %c10_53, %c0_54], %110 {strides = array<i32>} : memref<1x80x128xf32, #tpu.memory_space<vmem>>, vector<1x1x128xf32>,
    %c11_i32 = arith.constant 11 : i32
    %111 = arith.addi %0, %c11_i32 : i32
    %112 = arith.index_cast %111 : i32 to index
    %113 = memref.load %arg1[%112] : memref<160xi32, #tpu.memory_space<smem>>
    %114 = arith.index_cast %113 : i32 to index
    %c0_55 = arith.constant 0 : index
    %115 = vector.load %arg2[%114, %c0_55] : memref<512x128xf32, #tpu.memory_space<vmem>>, vector<1x128xf32>
    %c11 = arith.constant 11 : index
    %c0_56 = arith.constant 0 : index
    %116 = vector.load %arg3[%c11, %c0_56] : memref<80x128xf32, #tpu.memory_space<vmem>>, vector<1x128xf32>
    %117 = arith.addf %115, %116 : vector<1x128xf32>
    %c0_57 = arith.constant 0 : index
    %c11_58 = arith.constant 11 : index
    %c0_59 = arith.constant 0 : index
    %118 = vector.load %arg4[%c0_57, %c11_58, %c0_59] : memref<1x80x128xf32, #tpu.memory_space<vmem>>, vector<1x1x128xf32>
    %119 = vector.shape_cast %118 : vector<1x1x128xf32> to vector<1x128xf32>
    %120 = vector.shape_cast %117 : vector<1x128xf32> to vector<1x1x128xf32>
    tpu.vector_store %arg4[%c0_57, %c11_58, %c0_59], %120 {strides = array<i32>} : memref<1x80x128xf32, #tpu.memory_space<vmem>>, vector<1x1x128xf32>,
    %c12_i32 = arith.constant 12 : i32
    %121 = arith.addi %0, %c12_i32 : i32
    %122 = arith.index_cast %121 : i32 to index
    %123 = memref.load %arg1[%122] : memref<160xi32, #tpu.memory_space<smem>>
    %124 = arith.index_cast %123 : i32 to index
    %c0_60 = arith.constant 0 : index
    %125 = vector.load %arg2[%124, %c0_60] : memref<512x128xf32, #tpu.memory_space<vmem>>, vector<1x128xf32>
    %c12 = arith.constant 12 : index
    %c0_61 = arith.constant 0 : index
    %126 = vector.load %arg3[%c12, %c0_61] : memref<80x128xf32, #tpu.memory_space<vmem>>, vector<1x128xf32>
    %127 = arith.addf %125, %126 : vector<1x128xf32>
    %c0_62 = arith.constant 0 : index
    %c12_63 = arith.constant 12 : index
    %c0_64 = arith.constant 0 : index
    %128 = vector.load %arg4[%c0_62, %c12_63, %c0_64] : memref<1x80x128xf32, #tpu.memory_space<vmem>>, vector<1x1x128xf32>
    %129 = vector.shape_cast %128 : vector<1x1x128xf32> to vector<1x128xf32>
    %130 = vector.shape_cast %127 : vector<1x128xf32> to vector<1x1x128xf32>
    tpu.vector_store %arg4[%c0_62, %c12_63, %c0_64], %130 {strides = array<i32>} : memref<1x80x128xf32, #tpu.memory_space<vmem>>, vector<1x1x128xf32>,
    %c13_i32 = arith.constant 13 : i32
    %131 = arith.addi %0, %c13_i32 : i32
    %132 = arith.index_cast %131 : i32 to index
    %133 = memref.load %arg1[%132] : memref<160xi32, #tpu.memory_space<smem>>
    %134 = arith.index_cast %133 : i32 to index
    %c0_65 = arith.constant 0 : index
    %135 = vector.load %arg2[%134, %c0_65] : memref<512x128xf32, #tpu.memory_space<vmem>>, vector<1x128xf32>
    %c13 = arith.constant 13 : index
    %c0_66 = arith.constant 0 : index
    %136 = vector.load %arg3[%c13, %c0_66] : memref<80x128xf32, #tpu.memory_space<vmem>>, vector<1x128xf32>
    %137 = arith.addf %135, %136 : vector<1x128xf32>
    %c0_67 = arith.constant 0 : index
    %c13_68 = arith.constant 13 : index
    %c0_69 = arith.constant 0 : index
    %138 = vector.load %arg4[%c0_67, %c13_68, %c0_69] : memref<1x80x128xf32, #tpu.memory_space<vmem>>, vector<1x1x128xf32>
    %139 = vector.shape_cast %138 : vector<1x1x128xf32> to vector<1x128xf32>
    %140 = vector.shape_cast %137 : vector<1x128xf32> to vector<1x1x128xf32>
    tpu.vector_store %arg4[%c0_67, %c13_68, %c0_69], %140 {strides = array<i32>} : memref<1x80x128xf32, #tpu.memory_space<vmem>>, vector<1x1x128xf32>,
    %c14_i32 = arith.constant 14 : i32
    %141 = arith.addi %0, %c14_i32 : i32
    %142 = arith.index_cast %141 : i32 to index
    %143 = memref.load %arg1[%142] : memref<160xi32, #tpu.memory_space<smem>>
    %144 = arith.index_cast %143 : i32 to index
    %c0_70 = arith.constant 0 : index
    %145 = vector.load %arg2[%144, %c0_70] : memref<512x128xf32, #tpu.memory_space<vmem>>, vector<1x128xf32>
    %c14 = arith.constant 14 : index
    %c0_71 = arith.constant 0 : index
    %146 = vector.load %arg3[%c14, %c0_71] : memref<80x128xf32, #tpu.memory_space<vmem>>, vector<1x128xf32>
    %147 = arith.addf %145, %146 : vector<1x128xf32>
    %c0_72 = arith.constant 0 : index
    %c14_73 = arith.constant 14 : index
    %c0_74 = arith.constant 0 : index
    %148 = vector.load %arg4[%c0_72, %c14_73, %c0_74] : memref<1x80x128xf32, #tpu.memory_space<vmem>>, vector<1x1x128xf32>
    %149 = vector.shape_cast %148 : vector<1x1x128xf32> to vector<1x128xf32>
    %150 = vector.shape_cast %147 : vector<1x128xf32> to vector<1x1x128xf32>
    tpu.vector_store %arg4[%c0_72, %c14_73, %c0_74], %150 {strides = array<i32>} : memref<1x80x128xf32, #tpu.memory_space<vmem>>, vector<1x1x128xf32>,
    %c15_i32 = arith.constant 15 : i32
    %151 = arith.addi %0, %c15_i32 : i32
    %152 = arith.index_cast %151 : i32 to index
    %153 = memref.load %arg1[%152] : memref<160xi32, #tpu.memory_space<smem>>
    %154 = arith.index_cast %153 : i32 to index
    %c0_75 = arith.constant 0 : index
    %155 = vector.load %arg2[%154, %c0_75] : memref<512x128xf32, #tpu.memory_space<vmem>>, vector<1x128xf32>
    %c15 = arith.constant 15 : index
    %c0_76 = arith.constant 0 : index
    %156 = vector.load %arg3[%c15, %c0_76] : memref<80x128xf32, #tpu.memory_space<vmem>>, vector<1x128xf32>
    %157 = arith.addf %155, %156 : vector<1x128xf32>
    %c0_77 = arith.constant 0 : index
    %c15_78 = arith.constant 15 : index
    %c0_79 = arith.constant 0 : index
    %158 = vector.load %arg4[%c0_77, %c15_78, %c0_79] : memref<1x80x128xf32, #tpu.memory_space<vmem>>, vector<1x1x128xf32>
    %159 = vector.shape_cast %158 : vector<1x1x128xf32> to vector<1x128xf32>
    %160 = vector.shape_cast %157 : vector<1x128xf32> to vector<1x1x128xf32>
    tpu.vector_store %arg4[%c0_77, %c15_78, %c0_79], %160 {strides = array<i32>} : memref<1x80x128xf32, #tpu.memory_space<vmem>>, vector<1x1x128xf32>,
    %c16_i32 = arith.constant 16 : i32
    %161 = arith.addi %0, %c16_i32 : i32
    %162 = arith.index_cast %161 : i32 to index
    %163 = memref.load %arg1[%162] : memref<160xi32, #tpu.memory_space<smem>>
    %164 = arith.index_cast %163 : i32 to index
    %c0_80 = arith.constant 0 : index
    %165 = vector.load %arg2[%164, %c0_80] : memref<512x128xf32, #tpu.memory_space<vmem>>, vector<1x128xf32>
    %c16 = arith.constant 16 : index
    %c0_81 = arith.constant 0 : index
    %166 = vector.load %arg3[%c16, %c0_81] : memref<80x128xf32, #tpu.memory_space<vmem>>, vector<1x128xf32>
    %167 = arith.addf %165, %166 : vector<1x128xf32>
    %c0_82 = arith.constant 0 : index
    %c16_83 = arith.constant 16 : index
    %c0_84 = arith.constant 0 : index
    %168 = vector.load %arg4[%c0_82, %c16_83, %c0_84] : memref<1x80x128xf32, #tpu.memory_space<vmem>>, vector<1x1x128xf32>
    %169 = vector.shape_cast %168 : vector<1x1x128xf32> to vector<1x128xf32>
    %170 = vector.shape_cast %167 : vector<1x128xf32> to vector<1x1x128xf32>
    tpu.vector_store %arg4[%c0_82, %c16_83, %c0_84], %170 {strides = array<i32>} : memref<1x80x128xf32, #tpu.memory_space<vmem>>, vector<1x1x128xf32>,
    %c17_i32 = arith.constant 17 : i32
    %171 = arith.addi %0, %c17_i32 : i32
    %172 = arith.index_cast %171 : i32 to index
    %173 = memref.load %arg1[%172] : memref<160xi32, #tpu.memory_space<smem>>
    %174 = arith.index_cast %173 : i32 to index
    %c0_85 = arith.constant 0 : index
    %175 = vector.load %arg2[%174, %c0_85] : memref<512x128xf32, #tpu.memory_space<vmem>>, vector<1x128xf32>
    %c17 = arith.constant 17 : index
    %c0_86 = arith.constant 0 : index
    %176 = vector.load %arg3[%c17, %c0_86] : memref<80x128xf32, #tpu.memory_space<vmem>>, vector<1x128xf32>
    %177 = arith.addf %175, %176 : vector<1x128xf32>
    %c0_87 = arith.constant 0 : index
    %c17_88 = arith.constant 17 : index
    %c0_89 = arith.constant 0 : index
    %178 = vector.load %arg4[%c0_87, %c17_88, %c0_89] : memref<1x80x128xf32, #tpu.memory_space<vmem>>, vector<1x1x128xf32>
    %179 = vector.shape_cast %178 : vector<1x1x128xf32> to vector<1x128xf32>
    %180 = vector.shape_cast %177 : vector<1x128xf32> to vector<1x1x128xf32>
    tpu.vector_store %arg4[%c0_87, %c17_88, %c0_89], %180 {strides = array<i32>} : memref<1x80x128xf32, #tpu.memory_space<vmem>>, vector<1x1x128xf32>,
    %c18_i32 = arith.constant 18 : i32
    %181 = arith.addi %0, %c18_i32 : i32
    %182 = arith.index_cast %181 : i32 to index
    %183 = memref.load %arg1[%182] : memref<160xi32, #tpu.memory_space<smem>>
    %184 = arith.index_cast %183 : i32 to index
    %c0_90 = arith.constant 0 : index
    %185 = vector.load %arg2[%184, %c0_90] : memref<512x128xf32, #tpu.memory_space<vmem>>, vector<1x128xf32>
    %c18 = arith.constant 18 : index
    %c0_91 = arith.constant 0 : index
    %186 = vector.load %arg3[%c18, %c0_91] : memref<80x128xf32, #tpu.memory_space<vmem>>, vector<1x128xf32>
    %187 = arith.addf %185, %186 : vector<1x128xf32>
    %c0_92 = arith.constant 0 : index
    %c18_93 = arith.constant 18 : index
    %c0_94 = arith.constant 0 : index
    %188 = vector.load %arg4[%c0_92, %c18_93, %c0_94] : memref<1x80x128xf32, #tpu.memory_space<vmem>>, vector<1x1x128xf32>
    %189 = vector.shape_cast %188 : vector<1x1x128xf32> to vector<1x128xf32>
    %190 = vector.shape_cast %187 : vector<1x128xf32> to vector<1x1x128xf32>
    tpu.vector_store %arg4[%c0_92, %c18_93, %c0_94], %190 {strides = array<i32>} : memref<1x80x128xf32, #tpu.memory_space<vmem>>, vector<1x1x128xf32>,
    %c19_i32 = arith.constant 19 : i32
    %191 = arith.addi %0, %c19_i32 : i32
    %192 = arith.index_cast %191 : i32 to index
    %193 = memref.load %arg1[%192] : memref<160xi32, #tpu.memory_space<smem>>
    %194 = arith.index_cast %193 : i32 to index
    %c0_95 = arith.constant 0 : index
    %195 = vector.load %arg2[%194, %c0_95] : memref<512x128xf32, #tpu.memory_space<vmem>>, vector<1x128xf32>
    %c19 = arith.constant 19 : index
    %c0_96 = arith.constant 0 : index
    %196 = vector.load %arg3[%c19, %c0_96] : memref<80x128xf32, #tpu.memory_space<vmem>>, vector<1x128xf32>
    %197 = arith.addf %195, %196 : vector<1x128xf32>
    %c0_97 = arith.constant 0 : index
    %c19_98 = arith.constant 19 : index
    %c0_99 = arith.constant 0 : index
    %198 = vector.load %arg4[%c0_97, %c19_98, %c0_99] : memref<1x80x128xf32, #tpu.memory_space<vmem>>, vector<1x1x128xf32>
    %199 = vector.shape_cast %198 : vector<1x1x128xf32> to vector<1x128xf32>
    %200 = vector.shape_cast %197 : vector<1x128xf32> to vector<1x1x128xf32>
    tpu.vector_store %arg4[%c0_97, %c19_98, %c0_99], %200 {strides = array<i32>} : memref<1x80x128xf32, #tpu.memory_space<vmem>>, vector<1x1x128xf32>,
    %c20_i32 = arith.constant 20 : i32
    %201 = arith.addi %0, %c20_i32 : i32
    %202 = arith.index_cast %201 : i32 to index
    %203 = memref.load %arg1[%202] : memref<160xi32, #tpu.memory_space<smem>>
    %204 = arith.index_cast %203 : i32 to index
    %c0_100 = arith.constant 0 : index
    %205 = vector.load %arg2[%204, %c0_100] : memref<512x128xf32, #tpu.memory_space<vmem>>, vector<1x128xf32>
    %c20 = arith.constant 20 : index
    %c0_101 = arith.constant 0 : index
    %206 = vector.load %arg3[%c20, %c0_101] : memref<80x128xf32, #tpu.memory_space<vmem>>, vector<1x128xf32>
    %207 = arith.addf %205, %206 : vector<1x128xf32>
    %c0_102 = arith.constant 0 : index
    %c20_103 = arith.constant 20 : index
    %c0_104 = arith.constant 0 : index
    %208 = vector.load %arg4[%c0_102, %c20_103, %c0_104] : memref<1x80x128xf32, #tpu.memory_space<vmem>>, vector<1x1x128xf32>
    %209 = vector.shape_cast %208 : vector<1x1x128xf32> to vector<1x128xf32>
    %210 = vector.shape_cast %207 : vector<1x128xf32> to vector<1x1x128xf32>
    tpu.vector_store %arg4[%c0_102, %c20_103, %c0_104], %210 {strides = array<i32>} : memref<1x80x128xf32, #tpu.memory_space<vmem>>, vector<1x1x128xf32>,
    %c21_i32 = arith.constant 21 : i32
    %211 = arith.addi %0, %c21_i32 : i32
    %212 = arith.index_cast %211 : i32 to index
    %213 = memref.load %arg1[%212] : memref<160xi32, #tpu.memory_space<smem>>
    %214 = arith.index_cast %213 : i32 to index
    %c0_105 = arith.constant 0 : index
    %215 = vector.load %arg2[%214, %c0_105] : memref<512x128xf32, #tpu.memory_space<vmem>>, vector<1x128xf32>
    %c21 = arith.constant 21 : index
    %c0_106 = arith.constant 0 : index
    %216 = vector.load %arg3[%c21, %c0_106] : memref<80x128xf32, #tpu.memory_space<vmem>>, vector<1x128xf32>
    %217 = arith.addf %215, %216 : vector<1x128xf32>
    %c0_107 = arith.constant 0 : index
    %c21_108 = arith.constant 21 : index
    %c0_109 = arith.constant 0 : index
    %218 = vector.load %arg4[%c0_107, %c21_108, %c0_109] : memref<1x80x128xf32, #tpu.memory_space<vmem>>, vector<1x1x128xf32>
    %219 = vector.shape_cast %218 : vector<1x1x128xf32> to vector<1x128xf32>
    %220 = vector.shape_cast %217 : vector<1x128xf32> to vector<1x1x128xf32>
    tpu.vector_store %arg4[%c0_107, %c21_108, %c0_109], %220 {strides = array<i32>} : memref<1x80x128xf32, #tpu.memory_space<vmem>>, vector<1x1x128xf32>,
    %c22_i32 = arith.constant 22 : i32
    %221 = arith.addi %0, %c22_i32 : i32
    %222 = arith.index_cast %221 : i32 to index
    %223 = memref.load %arg1[%222] : memref<160xi32, #tpu.memory_space<smem>>
    %224 = arith.index_cast %223 : i32 to index
    %c0_110 = arith.constant 0 : index
    %225 = vector.load %arg2[%224, %c0_110] : memref<512x128xf32, #tpu.memory_space<vmem>>, vector<1x128xf32>
    %c22 = arith.constant 22 : index
    %c0_111 = arith.constant 0 : index
    %226 = vector.load %arg3[%c22, %c0_111] : memref<80x128xf32, #tpu.memory_space<vmem>>, vector<1x128xf32>
    %227 = arith.addf %225, %226 : vector<1x128xf32>
    %c0_112 = arith.constant 0 : index
    %c22_113 = arith.constant 22 : index
    %c0_114 = arith.constant 0 : index
    %228 = vector.load %arg4[%c0_112, %c22_113, %c0_114] : memref<1x80x128xf32, #tpu.memory_space<vmem>>, vector<1x1x128xf32>
    %229 = vector.shape_cast %228 : vector<1x1x128xf32> to vector<1x128xf32>
    %230 = vector.shape_cast %227 : vector<1x128xf32> to vector<1x1x128xf32>
    tpu.vector_store %arg4[%c0_112, %c22_113, %c0_114], %230 {strides = array<i32>} : memref<1x80x128xf32, #tpu.memory_space<vmem>>, vector<1x1x128xf32>,
    %c23_i32 = arith.constant 23 : i32
    %231 = arith.addi %0, %c23_i32 : i32
    %232 = arith.index_cast %231 : i32 to index
    %233 = memref.load %arg1[%232] : memref<160xi32, #tpu.memory_space<smem>>
    %234 = arith.index_cast %233 : i32 to index
    %c0_115 = arith.constant 0 : index
    %235 = vector.load %arg2[%234, %c0_115] : memref<512x128xf32, #tpu.memory_space<vmem>>, vector<1x128xf32>
    %c23 = arith.constant 23 : index
    %c0_116 = arith.constant 0 : index
    %236 = vector.load %arg3[%c23, %c0_116] : memref<80x128xf32, #tpu.memory_space<vmem>>, vector<1x128xf32>
    %237 = arith.addf %235, %236 : vector<1x128xf32>
    %c0_117 = arith.constant 0 : index
    %c23_118 = arith.constant 23 : index
    %c0_119 = arith.constant 0 : index
    %238 = vector.load %arg4[%c0_117, %c23_118, %c0_119] : memref<1x80x128xf32, #tpu.memory_space<vmem>>, vector<1x1x128xf32>
    %239 = vector.shape_cast %238 : vector<1x1x128xf32> to vector<1x128xf32>
    %240 = vector.shape_cast %237 : vector<1x128xf32> to vector<1x1x128xf32>
    tpu.vector_store %arg4[%c0_117, %c23_118, %c0_119], %240 {strides = array<i32>} : memref<1x80x128xf32, #tpu.memory_space<vmem>>, vector<1x1x128xf32>,
    %c24_i32 = arith.constant 24 : i32
    %241 = arith.addi %0, %c24_i32 : i32
    %242 = arith.index_cast %241 : i32 to index
    %243 = memref.load %arg1[%242] : memref<160xi32, #tpu.memory_space<smem>>
    %244 = arith.index_cast %243 : i32 to index
    %c0_120 = arith.constant 0 : index
    %245 = vector.load %arg2[%244, %c0_120] : memref<512x128xf32, #tpu.memory_space<vmem>>, vector<1x128xf32>
    %c24 = arith.constant 24 : index
    %c0_121 = arith.constant 0 : index
    %246 = vector.load %arg3[%c24, %c0_121] : memref<80x128xf32, #tpu.memory_space<vmem>>, vector<1x128xf32>
    %247 = arith.addf %245, %246 : vector<1x128xf32>
    %c0_122 = arith.constant 0 : index
    %c24_123 = arith.constant 24 : index
    %c0_124 = arith.constant 0 : index
    %248 = vector.load %arg4[%c0_122, %c24_123, %c0_124] : memref<1x80x128xf32, #tpu.memory_space<vmem>>, vector<1x1x128xf32>
    %249 = vector.shape_cast %248 : vector<1x1x128xf32> to vector<1x128xf32>
    %250 = vector.shape_cast %247 : vector<1x128xf32> to vector<1x1x128xf32>
    tpu.vector_store %arg4[%c0_122, %c24_123, %c0_124], %250 {strides = array<i32>} : memref<1x80x128xf32, #tpu.memory_space<vmem>>, vector<1x1x128xf32>,
    %c25_i32 = arith.constant 25 : i32
    %251 = arith.addi %0, %c25_i32 : i32
    %252 = arith.index_cast %251 : i32 to index
    %253 = memref.load %arg1[%252] : memref<160xi32, #tpu.memory_space<smem>>
    %254 = arith.index_cast %253 : i32 to index
    %c0_125 = arith.constant 0 : index
    %255 = vector.load %arg2[%254, %c0_125] : memref<512x128xf32, #tpu.memory_space<vmem>>, vector<1x128xf32>
    %c25 = arith.constant 25 : index
    %c0_126 = arith.constant 0 : index
    %256 = vector.load %arg3[%c25, %c0_126] : memref<80x128xf32, #tpu.memory_space<vmem>>, vector<1x128xf32>
    %257 = arith.addf %255, %256 : vector<1x128xf32>
    %c0_127 = arith.constant 0 : index
    %c25_128 = arith.constant 25 : index
    %c0_129 = arith.constant 0 : index
    %258 = vector.load %arg4[%c0_127, %c25_128, %c0_129] : memref<1x80x128xf32, #tpu.memory_space<vmem>>, vector<1x1x128xf32>
    %259 = vector.shape_cast %258 : vector<1x1x128xf32> to vector<1x128xf32>
    %260 = vector.shape_cast %257 : vector<1x128xf32> to vector<1x1x128xf32>
    tpu.vector_store %arg4[%c0_127, %c25_128, %c0_129], %260 {strides = array<i32>} : memref<1x80x128xf32, #tpu.memory_space<vmem>>, vector<1x1x128xf32>,
    %c26_i32 = arith.constant 26 : i32
    %261 = arith.addi %0, %c26_i32 : i32
    %262 = arith.index_cast %261 : i32 to index
    %263 = memref.load %arg1[%262] : memref<160xi32, #tpu.memory_space<smem>>
    %264 = arith.index_cast %263 : i32 to index
    %c0_130 = arith.constant 0 : index
    %265 = vector.load %arg2[%264, %c0_130] : memref<512x128xf32, #tpu.memory_space<vmem>>, vector<1x128xf32>
    %c26 = arith.constant 26 : index
    %c0_131 = arith.constant 0 : index
    %266 = vector.load %arg3[%c26, %c0_131] : memref<80x128xf32, #tpu.memory_space<vmem>>, vector<1x128xf32>
    %267 = arith.addf %265, %266 : vector<1x128xf32>
    %c0_132 = arith.constant 0 : index
    %c26_133 = arith.constant 26 : index
    %c0_134 = arith.constant 0 : index
    %268 = vector.load %arg4[%c0_132, %c26_133, %c0_134] : memref<1x80x128xf32, #tpu.memory_space<vmem>>, vector<1x1x128xf32>
    %269 = vector.shape_cast %268 : vector<1x1x128xf32> to vector<1x128xf32>
    %270 = vector.shape_cast %267 : vector<1x128xf32> to vector<1x1x128xf32>
    tpu.vector_store %arg4[%c0_132, %c26_133, %c0_134], %270 {strides = array<i32>} : memref<1x80x128xf32, #tpu.memory_space<vmem>>, vector<1x1x128xf32>,
    %c27_i32 = arith.constant 27 : i32
    %271 = arith.addi %0, %c27_i32 : i32
    %272 = arith.index_cast %271 : i32 to index
    %273 = memref.load %arg1[%272] : memref<160xi32, #tpu.memory_space<smem>>
    %274 = arith.index_cast %273 : i32 to index
    %c0_135 = arith.constant 0 : index
    %275 = vector.load %arg2[%274, %c0_135] : memref<512x128xf32, #tpu.memory_space<vmem>>, vector<1x128xf32>
    %c27 = arith.constant 27 : index
    %c0_136 = arith.constant 0 : index
    %276 = vector.load %arg3[%c27, %c0_136] : memref<80x128xf32, #tpu.memory_space<vmem>>, vector<1x128xf32>
    %277 = arith.addf %275, %276 : vector<1x128xf32>
    %c0_137 = arith.constant 0 : index
    %c27_138 = arith.constant 27 : index
    %c0_139 = arith.constant 0 : index
    %278 = vector.load %arg4[%c0_137, %c27_138, %c0_139] : memref<1x80x128xf32, #tpu.memory_space<vmem>>, vector<1x1x128xf32>
    %279 = vector.shape_cast %278 : vector<1x1x128xf32> to vector<1x128xf32>
    %280 = vector.shape_cast %277 : vector<1x128xf32> to vector<1x1x128xf32>
    tpu.vector_store %arg4[%c0_137, %c27_138, %c0_139], %280 {strides = array<i32>} : memref<1x80x128xf32, #tpu.memory_space<vmem>>, vector<1x1x128xf32>,
    %c28_i32 = arith.constant 28 : i32
    %281 = arith.addi %0, %c28_i32 : i32
    %282 = arith.index_cast %281 : i32 to index
    %283 = memref.load %arg1[%282] : memref<160xi32, #tpu.memory_space<smem>>
    %284 = arith.index_cast %283 : i32 to index
    %c0_140 = arith.constant 0 : index
    %285 = vector.load %arg2[%284, %c0_140] : memref<512x128xf32, #tpu.memory_space<vmem>>, vector<1x128xf32>
    %c28 = arith.constant 28 : index
    %c0_141 = arith.constant 0 : index
    %286 = vector.load %arg3[%c28, %c0_141] : memref<80x128xf32, #tpu.memory_space<vmem>>, vector<1x128xf32>
    %287 = arith.addf %285, %286 : vector<1x128xf32>
    %c0_142 = arith.constant 0 : index
    %c28_143 = arith.constant 28 : index
    %c0_144 = arith.constant 0 : index
    %288 = vector.load %arg4[%c0_142, %c28_143, %c0_144] : memref<1x80x128xf32, #tpu.memory_space<vmem>>, vector<1x1x128xf32>
    %289 = vector.shape_cast %288 : vector<1x1x128xf32> to vector<1x128xf32>
    %290 = vector.shape_cast %287 : vector<1x128xf32> to vector<1x1x128xf32>
    tpu.vector_store %arg4[%c0_142, %c28_143, %c0_144], %290 {strides = array<i32>} : memref<1x80x128xf32, #tpu.memory_space<vmem>>, vector<1x1x128xf32>,
    %c29_i32 = arith.constant 29 : i32
    %291 = arith.addi %0, %c29_i32 : i32
    %292 = arith.index_cast %291 : i32 to index
    %293 = memref.load %arg1[%292] : memref<160xi32, #tpu.memory_space<smem>>
    %294 = arith.index_cast %293 : i32 to index
    %c0_145 = arith.constant 0 : index
    %295 = vector.load %arg2[%294, %c0_145] : memref<512x128xf32, #tpu.memory_space<vmem>>, vector<1x128xf32>
    %c29 = arith.constant 29 : index
    %c0_146 = arith.constant 0 : index
    %296 = vector.load %arg3[%c29, %c0_146] : memref<80x128xf32, #tpu.memory_space<vmem>>, vector<1x128xf32>
    %297 = arith.addf %295, %296 : vector<1x128xf32>
    %c0_147 = arith.constant 0 : index
    %c29_148 = arith.constant 29 : index
    %c0_149 = arith.constant 0 : index
    %298 = vector.load %arg4[%c0_147, %c29_148, %c0_149] : memref<1x80x128xf32, #tpu.memory_space<vmem>>, vector<1x1x128xf32>
    %299 = vector.shape_cast %298 : vector<1x1x128xf32> to vector<1x128xf32>
    %300 = vector.shape_cast %297 : vector<1x128xf32> to vector<1x1x128xf32>
    tpu.vector_store %arg4[%c0_147, %c29_148, %c0_149], %300 {strides = array<i32>} : memref<1x80x128xf32, #tpu.memory_space<vmem>>, vector<1x1x128xf32>,
    %c30_i32 = arith.constant 30 : i32
    %301 = arith.addi %0, %c30_i32 : i32
    %302 = arith.index_cast %301 : i32 to index
    %303 = memref.load %arg1[%302] : memref<160xi32, #tpu.memory_space<smem>>
    %304 = arith.index_cast %303 : i32 to index
    %c0_150 = arith.constant 0 : index
    %305 = vector.load %arg2[%304, %c0_150] : memref<512x128xf32, #tpu.memory_space<vmem>>, vector<1x128xf32>
    %c30 = arith.constant 30 : index
    %c0_151 = arith.constant 0 : index
    %306 = vector.load %arg3[%c30, %c0_151] : memref<80x128xf32, #tpu.memory_space<vmem>>, vector<1x128xf32>
    %307 = arith.addf %305, %306 : vector<1x128xf32>
    %c0_152 = arith.constant 0 : index
    %c30_153 = arith.constant 30 : index
    %c0_154 = arith.constant 0 : index
    %308 = vector.load %arg4[%c0_152, %c30_153, %c0_154] : memref<1x80x128xf32, #tpu.memory_space<vmem>>, vector<1x1x128xf32>
    %309 = vector.shape_cast %308 : vector<1x1x128xf32> to vector<1x128xf32>
    %310 = vector.shape_cast %307 : vector<1x128xf32> to vector<1x1x128xf32>
    tpu.vector_store %arg4[%c0_152, %c30_153, %c0_154], %310 {strides = array<i32>} : memref<1x80x128xf32, #tpu.memory_space<vmem>>, vector<1x1x128xf32>,
    %c31_i32 = arith.constant 31 : i32
    %311 = arith.addi %0, %c31_i32 : i32
    %312 = arith.index_cast %311 : i32 to index
    %313 = memref.load %arg1[%312] : memref<160xi32, #tpu.memory_space<smem>>
    %314 = arith.index_cast %313 : i32 to index
    %c0_155 = arith.constant 0 : index
    %315 = vector.load %arg2[%314, %c0_155] : memref<512x128xf32, #tpu.memory_space<vmem>>, vector<1x128xf32>
    %c31 = arith.constant 31 : index
    %c0_156 = arith.constant 0 : index
    %316 = vector.load %arg3[%c31, %c0_156] : memref<80x128xf32, #tpu.memory_space<vmem>>, vector<1x128xf32>
    %317 = arith.addf %315, %316 : vector<1x128xf32>
    %c0_157 = arith.constant 0 : index
    %c31_158 = arith.constant 31 : index
    %c0_159 = arith.constant 0 : index
    %318 = vector.load %arg4[%c0_157, %c31_158, %c0_159] : memref<1x80x128xf32, #tpu.memory_space<vmem>>, vector<1x1x128xf32>
    %319 = vector.shape_cast %318 : vector<1x1x128xf32> to vector<1x128xf32>
    %320 = vector.shape_cast %317 : vector<1x128xf32> to vector<1x1x128xf32>
    tpu.vector_store %arg4[%c0_157, %c31_158, %c0_159], %320 {strides = array<i32>} : memref<1x80x128xf32, #tpu.memory_space<vmem>>, vector<1x1x128xf32>,
    %c32_i32 = arith.constant 32 : i32
    %321 = arith.addi %0, %c32_i32 : i32
    %322 = arith.index_cast %321 : i32 to index
    %323 = memref.load %arg1[%322] : memref<160xi32, #tpu.memory_space<smem>>
    %324 = arith.index_cast %323 : i32 to index
    %c0_160 = arith.constant 0 : index
    %325 = vector.load %arg2[%324, %c0_160] : memref<512x128xf32, #tpu.memory_space<vmem>>, vector<1x128xf32>
    %c32 = arith.constant 32 : index
    %c0_161 = arith.constant 0 : index
    %326 = vector.load %arg3[%c32, %c0_161] : memref<80x128xf32, #tpu.memory_space<vmem>>, vector<1x128xf32>
    %327 = arith.addf %325, %326 : vector<1x128xf32>
    %c0_162 = arith.constant 0 : index
    %c32_163 = arith.constant 32 : index
    %c0_164 = arith.constant 0 : index
    %328 = vector.load %arg4[%c0_162, %c32_163, %c0_164] : memref<1x80x128xf32, #tpu.memory_space<vmem>>, vector<1x1x128xf32>
    %329 = vector.shape_cast %328 : vector<1x1x128xf32> to vector<1x128xf32>
    %330 = vector.shape_cast %327 : vector<1x128xf32> to vector<1x1x128xf32>
    tpu.vector_store %arg4[%c0_162, %c32_163, %c0_164], %330 {strides = array<i32>} : memref<1x80x128xf32, #tpu.memory_space<vmem>>, vector<1x1x128xf32>,
    %c33_i32 = arith.constant 33 : i32
    %331 = arith.addi %0, %c33_i32 : i32
    %332 = arith.index_cast %331 : i32 to index
    %333 = memref.load %arg1[%332] : memref<160xi32, #tpu.memory_space<smem>>
    %334 = arith.index_cast %333 : i32 to index
    %c0_165 = arith.constant 0 : index
    %335 = vector.load %arg2[%334, %c0_165] : memref<512x128xf32, #tpu.memory_space<vmem>>, vector<1x128xf32>
    %c33 = arith.constant 33 : index
    %c0_166 = arith.constant 0 : index
    %336 = vector.load %arg3[%c33, %c0_166] : memref<80x128xf32, #tpu.memory_space<vmem>>, vector<1x128xf32>
    %337 = arith.addf %335, %336 : vector<1x128xf32>
    %c0_167 = arith.constant 0 : index
    %c33_168 = arith.constant 33 : index
    %c0_169 = arith.constant 0 : index
    %338 = vector.load %arg4[%c0_167, %c33_168, %c0_169] : memref<1x80x128xf32, #tpu.memory_space<vmem>>, vector<1x1x128xf32>
    %339 = vector.shape_cast %338 : vector<1x1x128xf32> to vector<1x128xf32>
    %340 = vector.shape_cast %337 : vector<1x128xf32> to vector<1x1x128xf32>
    tpu.vector_store %arg4[%c0_167, %c33_168, %c0_169], %340 {strides = array<i32>} : memref<1x80x128xf32, #tpu.memory_space<vmem>>, vector<1x1x128xf32>,
    %c34_i32 = arith.constant 34 : i32
    %341 = arith.addi %0, %c34_i32 : i32
    %342 = arith.index_cast %341 : i32 to index
    %343 = memref.load %arg1[%342] : memref<160xi32, #tpu.memory_space<smem>>
    %344 = arith.index_cast %343 : i32 to index
    %c0_170 = arith.constant 0 : index
    %345 = vector.load %arg2[%344, %c0_170] : memref<512x128xf32, #tpu.memory_space<vmem>>, vector<1x128xf32>
    %c34 = arith.constant 34 : index
    %c0_171 = arith.constant 0 : index
    %346 = vector.load %arg3[%c34, %c0_171] : memref<80x128xf32, #tpu.memory_space<vmem>>, vector<1x128xf32>
    %347 = arith.addf %345, %346 : vector<1x128xf32>
    %c0_172 = arith.constant 0 : index
    %c34_173 = arith.constant 34 : index
    %c0_174 = arith.constant 0 : index
    %348 = vector.load %arg4[%c0_172, %c34_173, %c0_174] : memref<1x80x128xf32, #tpu.memory_space<vmem>>, vector<1x1x128xf32>
    %349 = vector.shape_cast %348 : vector<1x1x128xf32> to vector<1x128xf32>
    %350 = vector.shape_cast %347 : vector<1x128xf32> to vector<1x1x128xf32>
    tpu.vector_store %arg4[%c0_172, %c34_173, %c0_174], %350 {strides = array<i32>} : memref<1x80x128xf32, #tpu.memory_space<vmem>>, vector<1x1x128xf32>,
    %c35_i32 = arith.constant 35 : i32
    %351 = arith.addi %0, %c35_i32 : i32
    %352 = arith.index_cast %351 : i32 to index
    %353 = memref.load %arg1[%352] : memref<160xi32, #tpu.memory_space<smem>>
    %354 = arith.index_cast %353 : i32 to index
    %c0_175 = arith.constant 0 : index
    %355 = vector.load %arg2[%354, %c0_175] : memref<512x128xf32, #tpu.memory_space<vmem>>, vector<1x128xf32>
    %c35 = arith.constant 35 : index
    %c0_176 = arith.constant 0 : index
    %356 = vector.load %arg3[%c35, %c0_176] : memref<80x128xf32, #tpu.memory_space<vmem>>, vector<1x128xf32>
    %357 = arith.addf %355, %356 : vector<1x128xf32>
    %c0_177 = arith.constant 0 : index
    %c35_178 = arith.constant 35 : index
    %c0_179 = arith.constant 0 : index
    %358 = vector.load %arg4[%c0_177, %c35_178, %c0_179] : memref<1x80x128xf32, #tpu.memory_space<vmem>>, vector<1x1x128xf32>
    %359 = vector.shape_cast %358 : vector<1x1x128xf32> to vector<1x128xf32>
    %360 = vector.shape_cast %357 : vector<1x128xf32> to vector<1x1x128xf32>
    tpu.vector_store %arg4[%c0_177, %c35_178, %c0_179], %360 {strides = array<i32>} : memref<1x80x128xf32, #tpu.memory_space<vmem>>, vector<1x1x128xf32>,
    %c36_i32 = arith.constant 36 : i32
    %361 = arith.addi %0, %c36_i32 : i32
    %362 = arith.index_cast %361 : i32 to index
    %363 = memref.load %arg1[%362] : memref<160xi32, #tpu.memory_space<smem>>
    %364 = arith.index_cast %363 : i32 to index
    %c0_180 = arith.constant 0 : index
    %365 = vector.load %arg2[%364, %c0_180] : memref<512x128xf32, #tpu.memory_space<vmem>>, vector<1x128xf32>
    %c36 = arith.constant 36 : index
    %c0_181 = arith.constant 0 : index
    %366 = vector.load %arg3[%c36, %c0_181] : memref<80x128xf32, #tpu.memory_space<vmem>>, vector<1x128xf32>
    %367 = arith.addf %365, %366 : vector<1x128xf32>
    %c0_182 = arith.constant 0 : index
    %c36_183 = arith.constant 36 : index
    %c0_184 = arith.constant 0 : index
    %368 = vector.load %arg4[%c0_182, %c36_183, %c0_184] : memref<1x80x128xf32, #tpu.memory_space<vmem>>, vector<1x1x128xf32>
    %369 = vector.shape_cast %368 : vector<1x1x128xf32> to vector<1x128xf32>
    %370 = vector.shape_cast %367 : vector<1x128xf32> to vector<1x1x128xf32>
    tpu.vector_store %arg4[%c0_182, %c36_183, %c0_184], %370 {strides = array<i32>} : memref<1x80x128xf32, #tpu.memory_space<vmem>>, vector<1x1x128xf32>,
    %c37_i32 = arith.constant 37 : i32
    %371 = arith.addi %0, %c37_i32 : i32
    %372 = arith.index_cast %371 : i32 to index
    %373 = memref.load %arg1[%372] : memref<160xi32, #tpu.memory_space<smem>>
    %374 = arith.index_cast %373 : i32 to index
    %c0_185 = arith.constant 0 : index
    %375 = vector.load %arg2[%374, %c0_185] : memref<512x128xf32, #tpu.memory_space<vmem>>, vector<1x128xf32>
    %c37 = arith.constant 37 : index
    %c0_186 = arith.constant 0 : index
    %376 = vector.load %arg3[%c37, %c0_186] : memref<80x128xf32, #tpu.memory_space<vmem>>, vector<1x128xf32>
    %377 = arith.addf %375, %376 : vector<1x128xf32>
    %c0_187 = arith.constant 0 : index
    %c37_188 = arith.constant 37 : index
    %c0_189 = arith.constant 0 : index
    %378 = vector.load %arg4[%c0_187, %c37_188, %c0_189] : memref<1x80x128xf32, #tpu.memory_space<vmem>>, vector<1x1x128xf32>
    %379 = vector.shape_cast %378 : vector<1x1x128xf32> to vector<1x128xf32>
    %380 = vector.shape_cast %377 : vector<1x128xf32> to vector<1x1x128xf32>
    tpu.vector_store %arg4[%c0_187, %c37_188, %c0_189], %380 {strides = array<i32>} : memref<1x80x128xf32, #tpu.memory_space<vmem>>, vector<1x1x128xf32>,
    %c38_i32 = arith.constant 38 : i32
    %381 = arith.addi %0, %c38_i32 : i32
    %382 = arith.index_cast %381 : i32 to index
    %383 = memref.load %arg1[%382] : memref<160xi32, #tpu.memory_space<smem>>
    %384 = arith.index_cast %383 : i32 to index
    %c0_190 = arith.constant 0 : index
    %385 = vector.load %arg2[%384, %c0_190] : memref<512x128xf32, #tpu.memory_space<vmem>>, vector<1x128xf32>
    %c38 = arith.constant 38 : index
    %c0_191 = arith.constant 0 : index
    %386 = vector.load %arg3[%c38, %c0_191] : memref<80x128xf32, #tpu.memory_space<vmem>>, vector<1x128xf32>
    %387 = arith.addf %385, %386 : vector<1x128xf32>
    %c0_192 = arith.constant 0 : index
    %c38_193 = arith.constant 38 : index
    %c0_194 = arith.constant 0 : index
    %388 = vector.load %arg4[%c0_192, %c38_193, %c0_194] : memref<1x80x128xf32, #tpu.memory_space<vmem>>, vector<1x1x128xf32>
    %389 = vector.shape_cast %388 : vector<1x1x128xf32> to vector<1x128xf32>
    %390 = vector.shape_cast %387 : vector<1x128xf32> to vector<1x1x128xf32>
    tpu.vector_store %arg4[%c0_192, %c38_193, %c0_194], %390 {strides = array<i32>} : memref<1x80x128xf32, #tpu.memory_space<vmem>>, vector<1x1x128xf32>,
    %c39_i32 = arith.constant 39 : i32
    %391 = arith.addi %0, %c39_i32 : i32
    %392 = arith.index_cast %391 : i32 to index
    %393 = memref.load %arg1[%392] : memref<160xi32, #tpu.memory_space<smem>>
    %394 = arith.index_cast %393 : i32 to index
    %c0_195 = arith.constant 0 : index
    %395 = vector.load %arg2[%394, %c0_195] : memref<512x128xf32, #tpu.memory_space<vmem>>, vector<1x128xf32>
    %c39 = arith.constant 39 : index
    %c0_196 = arith.constant 0 : index
    %396 = vector.load %arg3[%c39, %c0_196] : memref<80x128xf32, #tpu.memory_space<vmem>>, vector<1x128xf32>
    %397 = arith.addf %395, %396 : vector<1x128xf32>
    %c0_197 = arith.constant 0 : index
    %c39_198 = arith.constant 39 : index
    %c0_199 = arith.constant 0 : index
    %398 = vector.load %arg4[%c0_197, %c39_198, %c0_199] : memref<1x80x128xf32, #tpu.memory_space<vmem>>, vector<1x1x128xf32>
    %399 = vector.shape_cast %398 : vector<1x1x128xf32> to vector<1x128xf32>
    %400 = vector.shape_cast %397 : vector<1x128xf32> to vector<1x1x128xf32>
    tpu.vector_store %arg4[%c0_197, %c39_198, %c0_199], %400 {strides = array<i32>} : memref<1x80x128xf32, #tpu.memory_space<vmem>>, vector<1x1x128xf32>,
    %c40_i32 = arith.constant 40 : i32
    %401 = arith.addi %0, %c40_i32 : i32
    %402 = arith.index_cast %401 : i32 to index
    %403 = memref.load %arg1[%402] : memref<160xi32, #tpu.memory_space<smem>>
    %404 = arith.index_cast %403 : i32 to index
    %c0_200 = arith.constant 0 : index
    %405 = vector.load %arg2[%404, %c0_200] : memref<512x128xf32, #tpu.memory_space<vmem>>, vector<1x128xf32>
    %c40 = arith.constant 40 : index
    %c0_201 = arith.constant 0 : index
    %406 = vector.load %arg3[%c40, %c0_201] : memref<80x128xf32, #tpu.memory_space<vmem>>, vector<1x128xf32>
    %407 = arith.addf %405, %406 : vector<1x128xf32>
    %c0_202 = arith.constant 0 : index
    %c40_203 = arith.constant 40 : index
    %c0_204 = arith.constant 0 : index
    %408 = vector.load %arg4[%c0_202, %c40_203, %c0_204] : memref<1x80x128xf32, #tpu.memory_space<vmem>>, vector<1x1x128xf32>
    %409 = vector.shape_cast %408 : vector<1x1x128xf32> to vector<1x128xf32>
    %410 = vector.shape_cast %407 : vector<1x128xf32> to vector<1x1x128xf32>
    tpu.vector_store %arg4[%c0_202, %c40_203, %c0_204], %410 {strides = array<i32>} : memref<1x80x128xf32, #tpu.memory_space<vmem>>, vector<1x1x128xf32>,
    %c41_i32 = arith.constant 41 : i32
    %411 = arith.addi %0, %c41_i32 : i32
    %412 = arith.index_cast %411 : i32 to index
    %413 = memref.load %arg1[%412] : memref<160xi32, #tpu.memory_space<smem>>
    %414 = arith.index_cast %413 : i32 to index
    %c0_205 = arith.constant 0 : index
    %415 = vector.load %arg2[%414, %c0_205] : memref<512x128xf32, #tpu.memory_space<vmem>>, vector<1x128xf32>
    %c41 = arith.constant 41 : index
    %c0_206 = arith.constant 0 : index
    %416 = vector.load %arg3[%c41, %c0_206] : memref<80x128xf32, #tpu.memory_space<vmem>>, vector<1x128xf32>
    %417 = arith.addf %415, %416 : vector<1x128xf32>
    %c0_207 = arith.constant 0 : index
    %c41_208 = arith.constant 41 : index
    %c0_209 = arith.constant 0 : index
    %418 = vector.load %arg4[%c0_207, %c41_208, %c0_209] : memref<1x80x128xf32, #tpu.memory_space<vmem>>, vector<1x1x128xf32>
    %419 = vector.shape_cast %418 : vector<1x1x128xf32> to vector<1x128xf32>
    %420 = vector.shape_cast %417 : vector<1x128xf32> to vector<1x1x128xf32>
    tpu.vector_store %arg4[%c0_207, %c41_208, %c0_209], %420 {strides = array<i32>} : memref<1x80x128xf32, #tpu.memory_space<vmem>>, vector<1x1x128xf32>,
    %c42_i32 = arith.constant 42 : i32
    %421 = arith.addi %0, %c42_i32 : i32
    %422 = arith.index_cast %421 : i32 to index
    %423 = memref.load %arg1[%422] : memref<160xi32, #tpu.memory_space<smem>>
    %424 = arith.index_cast %423 : i32 to index
    %c0_210 = arith.constant 0 : index
    %425 = vector.load %arg2[%424, %c0_210] : memref<512x128xf32, #tpu.memory_space<vmem>>, vector<1x128xf32>
    %c42 = arith.constant 42 : index
    %c0_211 = arith.constant 0 : index
    %426 = vector.load %arg3[%c42, %c0_211] : memref<80x128xf32, #tpu.memory_space<vmem>>, vector<1x128xf32>
    %427 = arith.addf %425, %426 : vector<1x128xf32>
    %c0_212 = arith.constant 0 : index
    %c42_213 = arith.constant 42 : index
    %c0_214 = arith.constant 0 : index
    %428 = vector.load %arg4[%c0_212, %c42_213, %c0_214] : memref<1x80x128xf32, #tpu.memory_space<vmem>>, vector<1x1x128xf32>
    %429 = vector.shape_cast %428 : vector<1x1x128xf32> to vector<1x128xf32>
    %430 = vector.shape_cast %427 : vector<1x128xf32> to vector<1x1x128xf32>
    tpu.vector_store %arg4[%c0_212, %c42_213, %c0_214], %430 {strides = array<i32>} : memref<1x80x128xf32, #tpu.memory_space<vmem>>, vector<1x1x128xf32>,
    %c43_i32 = arith.constant 43 : i32
    %431 = arith.addi %0, %c43_i32 : i32
    %432 = arith.index_cast %431 : i32 to index
    %433 = memref.load %arg1[%432] : memref<160xi32, #tpu.memory_space<smem>>
    %434 = arith.index_cast %433 : i32 to index
    %c0_215 = arith.constant 0 : index
    %435 = vector.load %arg2[%434, %c0_215] : memref<512x128xf32, #tpu.memory_space<vmem>>, vector<1x128xf32>
    %c43 = arith.constant 43 : index
    %c0_216 = arith.constant 0 : index
    %436 = vector.load %arg3[%c43, %c0_216] : memref<80x128xf32, #tpu.memory_space<vmem>>, vector<1x128xf32>
    %437 = arith.addf %435, %436 : vector<1x128xf32>
    %c0_217 = arith.constant 0 : index
    %c43_218 = arith.constant 43 : index
    %c0_219 = arith.constant 0 : index
    %438 = vector.load %arg4[%c0_217, %c43_218, %c0_219] : memref<1x80x128xf32, #tpu.memory_space<vmem>>, vector<1x1x128xf32>
    %439 = vector.shape_cast %438 : vector<1x1x128xf32> to vector<1x128xf32>
    %440 = vector.shape_cast %437 : vector<1x128xf32> to vector<1x1x128xf32>
    tpu.vector_store %arg4[%c0_217, %c43_218, %c0_219], %440 {strides = array<i32>} : memref<1x80x128xf32, #tpu.memory_space<vmem>>, vector<1x1x128xf32>,
    %c44_i32 = arith.constant 44 : i32
    %441 = arith.addi %0, %c44_i32 : i32
    %442 = arith.index_cast %441 : i32 to index
    %443 = memref.load %arg1[%442] : memref<160xi32, #tpu.memory_space<smem>>
    %444 = arith.index_cast %443 : i32 to index
    %c0_220 = arith.constant 0 : index
    %445 = vector.load %arg2[%444, %c0_220] : memref<512x128xf32, #tpu.memory_space<vmem>>, vector<1x128xf32>
    %c44 = arith.constant 44 : index
    %c0_221 = arith.constant 0 : index
    %446 = vector.load %arg3[%c44, %c0_221] : memref<80x128xf32, #tpu.memory_space<vmem>>, vector<1x128xf32>
    %447 = arith.addf %445, %446 : vector<1x128xf32>
    %c0_222 = arith.constant 0 : index
    %c44_223 = arith.constant 44 : index
    %c0_224 = arith.constant 0 : index
    %448 = vector.load %arg4[%c0_222, %c44_223, %c0_224] : memref<1x80x128xf32, #tpu.memory_space<vmem>>, vector<1x1x128xf32>
    %449 = vector.shape_cast %448 : vector<1x1x128xf32> to vector<1x128xf32>
    %450 = vector.shape_cast %447 : vector<1x128xf32> to vector<1x1x128xf32>
    tpu.vector_store %arg4[%c0_222, %c44_223, %c0_224], %450 {strides = array<i32>} : memref<1x80x128xf32, #tpu.memory_space<vmem>>, vector<1x1x128xf32>,
    %c45_i32 = arith.constant 45 : i32
    %451 = arith.addi %0, %c45_i32 : i32
    %452 = arith.index_cast %451 : i32 to index
    %453 = memref.load %arg1[%452] : memref<160xi32, #tpu.memory_space<smem>>
    %454 = arith.index_cast %453 : i32 to index
    %c0_225 = arith.constant 0 : index
    %455 = vector.load %arg2[%454, %c0_225] : memref<512x128xf32, #tpu.memory_space<vmem>>, vector<1x128xf32>
    %c45 = arith.constant 45 : index
    %c0_226 = arith.constant 0 : index
    %456 = vector.load %arg3[%c45, %c0_226] : memref<80x128xf32, #tpu.memory_space<vmem>>, vector<1x128xf32>
    %457 = arith.addf %455, %456 : vector<1x128xf32>
    %c0_227 = arith.constant 0 : index
    %c45_228 = arith.constant 45 : index
    %c0_229 = arith.constant 0 : index
    %458 = vector.load %arg4[%c0_227, %c45_228, %c0_229] : memref<1x80x128xf32, #tpu.memory_space<vmem>>, vector<1x1x128xf32>
    %459 = vector.shape_cast %458 : vector<1x1x128xf32> to vector<1x128xf32>
    %460 = vector.shape_cast %457 : vector<1x128xf32> to vector<1x1x128xf32>
    tpu.vector_store %arg4[%c0_227, %c45_228, %c0_229], %460 {strides = array<i32>} : memref<1x80x128xf32, #tpu.memory_space<vmem>>, vector<1x1x128xf32>,
    %c46_i32 = arith.constant 46 : i32
    %461 = arith.addi %0, %c46_i32 : i32
    %462 = arith.index_cast %461 : i32 to index
    %463 = memref.load %arg1[%462] : memref<160xi32, #tpu.memory_space<smem>>
    %464 = arith.index_cast %463 : i32 to index
    %c0_230 = arith.constant 0 : index
    %465 = vector.load %arg2[%464, %c0_230] : memref<512x128xf32, #tpu.memory_space<vmem>>, vector<1x128xf32>
    %c46 = arith.constant 46 : index
    %c0_231 = arith.constant 0 : index
    %466 = vector.load %arg3[%c46, %c0_231] : memref<80x128xf32, #tpu.memory_space<vmem>>, vector<1x128xf32>
    %467 = arith.addf %465, %466 : vector<1x128xf32>
    %c0_232 = arith.constant 0 : index
    %c46_233 = arith.constant 46 : index
    %c0_234 = arith.constant 0 : index
    %468 = vector.load %arg4[%c0_232, %c46_233, %c0_234] : memref<1x80x128xf32, #tpu.memory_space<vmem>>, vector<1x1x128xf32>
    %469 = vector.shape_cast %468 : vector<1x1x128xf32> to vector<1x128xf32>
    %470 = vector.shape_cast %467 : vector<1x128xf32> to vector<1x1x128xf32>
    tpu.vector_store %arg4[%c0_232, %c46_233, %c0_234], %470 {strides = array<i32>} : memref<1x80x128xf32, #tpu.memory_space<vmem>>, vector<1x1x128xf32>,
    %c47_i32 = arith.constant 47 : i32
    %471 = arith.addi %0, %c47_i32 : i32
    %472 = arith.index_cast %471 : i32 to index
    %473 = memref.load %arg1[%472] : memref<160xi32, #tpu.memory_space<smem>>
    %474 = arith.index_cast %473 : i32 to index
    %c0_235 = arith.constant 0 : index
    %475 = vector.load %arg2[%474, %c0_235] : memref<512x128xf32, #tpu.memory_space<vmem>>, vector<1x128xf32>
    %c47 = arith.constant 47 : index
    %c0_236 = arith.constant 0 : index
    %476 = vector.load %arg3[%c47, %c0_236] : memref<80x128xf32, #tpu.memory_space<vmem>>, vector<1x128xf32>
    %477 = arith.addf %475, %476 : vector<1x128xf32>
    %c0_237 = arith.constant 0 : index
    %c47_238 = arith.constant 47 : index
    %c0_239 = arith.constant 0 : index
    %478 = vector.load %arg4[%c0_237, %c47_238, %c0_239] : memref<1x80x128xf32, #tpu.memory_space<vmem>>, vector<1x1x128xf32>
    %479 = vector.shape_cast %478 : vector<1x1x128xf32> to vector<1x128xf32>
    %480 = vector.shape_cast %477 : vector<1x128xf32> to vector<1x1x128xf32>
    tpu.vector_store %arg4[%c0_237, %c47_238, %c0_239], %480 {strides = array<i32>} : memref<1x80x128xf32, #tpu.memory_space<vmem>>, vector<1x1x128xf32>,
    %c48_i32 = arith.constant 48 : i32
    %481 = arith.addi %0, %c48_i32 : i32
    %482 = arith.index_cast %481 : i32 to index
    %483 = memref.load %arg1[%482] : memref<160xi32, #tpu.memory_space<smem>>
    %484 = arith.index_cast %483 : i32 to index
    %c0_240 = arith.constant 0 : index
    %485 = vector.load %arg2[%484, %c0_240] : memref<512x128xf32, #tpu.memory_space<vmem>>, vector<1x128xf32>
    %c48 = arith.constant 48 : index
    %c0_241 = arith.constant 0 : index
    %486 = vector.load %arg3[%c48, %c0_241] : memref<80x128xf32, #tpu.memory_space<vmem>>, vector<1x128xf32>
    %487 = arith.addf %485, %486 : vector<1x128xf32>
    %c0_242 = arith.constant 0 : index
    %c48_243 = arith.constant 48 : index
    %c0_244 = arith.constant 0 : index
    %488 = vector.load %arg4[%c0_242, %c48_243, %c0_244] : memref<1x80x128xf32, #tpu.memory_space<vmem>>, vector<1x1x128xf32>
    %489 = vector.shape_cast %488 : vector<1x1x128xf32> to vector<1x128xf32>
    %490 = vector.shape_cast %487 : vector<1x128xf32> to vector<1x1x128xf32>
    tpu.vector_store %arg4[%c0_242, %c48_243, %c0_244], %490 {strides = array<i32>} : memref<1x80x128xf32, #tpu.memory_space<vmem>>, vector<1x1x128xf32>,
    %c49_i32 = arith.constant 49 : i32
    %491 = arith.addi %0, %c49_i32 : i32
    %492 = arith.index_cast %491 : i32 to index
    %493 = memref.load %arg1[%492] : memref<160xi32, #tpu.memory_space<smem>>
    %494 = arith.index_cast %493 : i32 to index
    %c0_245 = arith.constant 0 : index
    %495 = vector.load %arg2[%494, %c0_245] : memref<512x128xf32, #tpu.memory_space<vmem>>, vector<1x128xf32>
    %c49 = arith.constant 49 : index
    %c0_246 = arith.constant 0 : index
    %496 = vector.load %arg3[%c49, %c0_246] : memref<80x128xf32, #tpu.memory_space<vmem>>, vector<1x128xf32>
    %497 = arith.addf %495, %496 : vector<1x128xf32>
    %c0_247 = arith.constant 0 : index
    %c49_248 = arith.constant 49 : index
    %c0_249 = arith.constant 0 : index
    %498 = vector.load %arg4[%c0_247, %c49_248, %c0_249] : memref<1x80x128xf32, #tpu.memory_space<vmem>>, vector<1x1x128xf32>
    %499 = vector.shape_cast %498 : vector<1x1x128xf32> to vector<1x128xf32>
    %500 = vector.shape_cast %497 : vector<1x128xf32> to vector<1x1x128xf32>
    tpu.vector_store %arg4[%c0_247, %c49_248, %c0_249], %500 {strides = array<i32>} : memref<1x80x128xf32, #tpu.memory_space<vmem>>, vector<1x1x128xf32>,
    %c50_i32 = arith.constant 50 : i32
    %501 = arith.addi %0, %c50_i32 : i32
    %502 = arith.index_cast %501 : i32 to index
    %503 = memref.load %arg1[%502] : memref<160xi32, #tpu.memory_space<smem>>
    %504 = arith.index_cast %503 : i32 to index
    %c0_250 = arith.constant 0 : index
    %505 = vector.load %arg2[%504, %c0_250] : memref<512x128xf32, #tpu.memory_space<vmem>>, vector<1x128xf32>
    %c50 = arith.constant 50 : index
    %c0_251 = arith.constant 0 : index
    %506 = vector.load %arg3[%c50, %c0_251] : memref<80x128xf32, #tpu.memory_space<vmem>>, vector<1x128xf32>
    %507 = arith.addf %505, %506 : vector<1x128xf32>
    %c0_252 = arith.constant 0 : index
    %c50_253 = arith.constant 50 : index
    %c0_254 = arith.constant 0 : index
    %508 = vector.load %arg4[%c0_252, %c50_253, %c0_254] : memref<1x80x128xf32, #tpu.memory_space<vmem>>, vector<1x1x128xf32>
    %509 = vector.shape_cast %508 : vector<1x1x128xf32> to vector<1x128xf32>
    %510 = vector.shape_cast %507 : vector<1x128xf32> to vector<1x1x128xf32>
    tpu.vector_store %arg4[%c0_252, %c50_253, %c0_254], %510 {strides = array<i32>} : memref<1x80x128xf32, #tpu.memory_space<vmem>>, vector<1x1x128xf32>,
    %c51_i32 = arith.constant 51 : i32
    %511 = arith.addi %0, %c51_i32 : i32
    %512 = arith.index_cast %511 : i32 to index
    %513 = memref.load %arg1[%512] : memref<160xi32, #tpu.memory_space<smem>>
    %514 = arith.index_cast %513 : i32 to index
    %c0_255 = arith.constant 0 : index
    %515 = vector.load %arg2[%514, %c0_255] : memref<512x128xf32, #tpu.memory_space<vmem>>, vector<1x128xf32>
    %c51 = arith.constant 51 : index
    %c0_256 = arith.constant 0 : index
    %516 = vector.load %arg3[%c51, %c0_256] : memref<80x128xf32, #tpu.memory_space<vmem>>, vector<1x128xf32>
    %517 = arith.addf %515, %516 : vector<1x128xf32>
    %c0_257 = arith.constant 0 : index
    %c51_258 = arith.constant 51 : index
    %c0_259 = arith.constant 0 : index
    %518 = vector.load %arg4[%c0_257, %c51_258, %c0_259] : memref<1x80x128xf32, #tpu.memory_space<vmem>>, vector<1x1x128xf32>
    %519 = vector.shape_cast %518 : vector<1x1x128xf32> to vector<1x128xf32>
    %520 = vector.shape_cast %517 : vector<1x128xf32> to vector<1x1x128xf32>
    tpu.vector_store %arg4[%c0_257, %c51_258, %c0_259], %520 {strides = array<i32>} : memref<1x80x128xf32, #tpu.memory_space<vmem>>, vector<1x1x128xf32>,
    %c52_i32 = arith.constant 52 : i32
    %521 = arith.addi %0, %c52_i32 : i32
    %522 = arith.index_cast %521 : i32 to index
    %523 = memref.load %arg1[%522] : memref<160xi32, #tpu.memory_space<smem>>
    %524 = arith.index_cast %523 : i32 to index
    %c0_260 = arith.constant 0 : index
    %525 = vector.load %arg2[%524, %c0_260] : memref<512x128xf32, #tpu.memory_space<vmem>>, vector<1x128xf32>
    %c52 = arith.constant 52 : index
    %c0_261 = arith.constant 0 : index
    %526 = vector.load %arg3[%c52, %c0_261] : memref<80x128xf32, #tpu.memory_space<vmem>>, vector<1x128xf32>
    %527 = arith.addf %525, %526 : vector<1x128xf32>
    %c0_262 = arith.constant 0 : index
    %c52_263 = arith.constant 52 : index
    %c0_264 = arith.constant 0 : index
    %528 = vector.load %arg4[%c0_262, %c52_263, %c0_264] : memref<1x80x128xf32, #tpu.memory_space<vmem>>, vector<1x1x128xf32>
    %529 = vector.shape_cast %528 : vector<1x1x128xf32> to vector<1x128xf32>
    %530 = vector.shape_cast %527 : vector<1x128xf32> to vector<1x1x128xf32>
    tpu.vector_store %arg4[%c0_262, %c52_263, %c0_264], %530 {strides = array<i32>} : memref<1x80x128xf32, #tpu.memory_space<vmem>>, vector<1x1x128xf32>,
    %c53_i32 = arith.constant 53 : i32
    %531 = arith.addi %0, %c53_i32 : i32
    %532 = arith.index_cast %531 : i32 to index
    %533 = memref.load %arg1[%532] : memref<160xi32, #tpu.memory_space<smem>>
    %534 = arith.index_cast %533 : i32 to index
    %c0_265 = arith.constant 0 : index
    %535 = vector.load %arg2[%534, %c0_265] : memref<512x128xf32, #tpu.memory_space<vmem>>, vector<1x128xf32>
    %c53 = arith.constant 53 : index
    %c0_266 = arith.constant 0 : index
    %536 = vector.load %arg3[%c53, %c0_266] : memref<80x128xf32, #tpu.memory_space<vmem>>, vector<1x128xf32>
    %537 = arith.addf %535, %536 : vector<1x128xf32>
    %c0_267 = arith.constant 0 : index
    %c53_268 = arith.constant 53 : index
    %c0_269 = arith.constant 0 : index
    %538 = vector.load %arg4[%c0_267, %c53_268, %c0_269] : memref<1x80x128xf32, #tpu.memory_space<vmem>>, vector<1x1x128xf32>
    %539 = vector.shape_cast %538 : vector<1x1x128xf32> to vector<1x128xf32>
    %540 = vector.shape_cast %537 : vector<1x128xf32> to vector<1x1x128xf32>
    tpu.vector_store %arg4[%c0_267, %c53_268, %c0_269], %540 {strides = array<i32>} : memref<1x80x128xf32, #tpu.memory_space<vmem>>, vector<1x1x128xf32>,
    %c54_i32 = arith.constant 54 : i32
    %541 = arith.addi %0, %c54_i32 : i32
    %542 = arith.index_cast %541 : i32 to index
    %543 = memref.load %arg1[%542] : memref<160xi32, #tpu.memory_space<smem>>
    %544 = arith.index_cast %543 : i32 to index
    %c0_270 = arith.constant 0 : index
    %545 = vector.load %arg2[%544, %c0_270] : memref<512x128xf32, #tpu.memory_space<vmem>>, vector<1x128xf32>
    %c54 = arith.constant 54 : index
    %c0_271 = arith.constant 0 : index
    %546 = vector.load %arg3[%c54, %c0_271] : memref<80x128xf32, #tpu.memory_space<vmem>>, vector<1x128xf32>
    %547 = arith.addf %545, %546 : vector<1x128xf32>
    %c0_272 = arith.constant 0 : index
    %c54_273 = arith.constant 54 : index
    %c0_274 = arith.constant 0 : index
    %548 = vector.load %arg4[%c0_272, %c54_273, %c0_274] : memref<1x80x128xf32, #tpu.memory_space<vmem>>, vector<1x1x128xf32>
    %549 = vector.shape_cast %548 : vector<1x1x128xf32> to vector<1x128xf32>
    %550 = vector.shape_cast %547 : vector<1x128xf32> to vector<1x1x128xf32>
    tpu.vector_store %arg4[%c0_272, %c54_273, %c0_274], %550 {strides = array<i32>} : memref<1x80x128xf32, #tpu.memory_space<vmem>>, vector<1x1x128xf32>,
    %c55_i32 = arith.constant 55 : i32
    %551 = arith.addi %0, %c55_i32 : i32
    %552 = arith.index_cast %551 : i32 to index
    %553 = memref.load %arg1[%552] : memref<160xi32, #tpu.memory_space<smem>>
    %554 = arith.index_cast %553 : i32 to index
    %c0_275 = arith.constant 0 : index
    %555 = vector.load %arg2[%554, %c0_275] : memref<512x128xf32, #tpu.memory_space<vmem>>, vector<1x128xf32>
    %c55 = arith.constant 55 : index
    %c0_276 = arith.constant 0 : index
    %556 = vector.load %arg3[%c55, %c0_276] : memref<80x128xf32, #tpu.memory_space<vmem>>, vector<1x128xf32>
    %557 = arith.addf %555, %556 : vector<1x128xf32>
    %c0_277 = arith.constant 0 : index
    %c55_278 = arith.constant 55 : index
    %c0_279 = arith.constant 0 : index
    %558 = vector.load %arg4[%c0_277, %c55_278, %c0_279] : memref<1x80x128xf32, #tpu.memory_space<vmem>>, vector<1x1x128xf32>
    %559 = vector.shape_cast %558 : vector<1x1x128xf32> to vector<1x128xf32>
    %560 = vector.shape_cast %557 : vector<1x128xf32> to vector<1x1x128xf32>
    tpu.vector_store %arg4[%c0_277, %c55_278, %c0_279], %560 {strides = array<i32>} : memref<1x80x128xf32, #tpu.memory_space<vmem>>, vector<1x1x128xf32>,
    %c56_i32 = arith.constant 56 : i32
    %561 = arith.addi %0, %c56_i32 : i32
    %562 = arith.index_cast %561 : i32 to index
    %563 = memref.load %arg1[%562] : memref<160xi32, #tpu.memory_space<smem>>
    %564 = arith.index_cast %563 : i32 to index
    %c0_280 = arith.constant 0 : index
    %565 = vector.load %arg2[%564, %c0_280] : memref<512x128xf32, #tpu.memory_space<vmem>>, vector<1x128xf32>
    %c56 = arith.constant 56 : index
    %c0_281 = arith.constant 0 : index
    %566 = vector.load %arg3[%c56, %c0_281] : memref<80x128xf32, #tpu.memory_space<vmem>>, vector<1x128xf32>
    %567 = arith.addf %565, %566 : vector<1x128xf32>
    %c0_282 = arith.constant 0 : index
    %c56_283 = arith.constant 56 : index
    %c0_284 = arith.constant 0 : index
    %568 = vector.load %arg4[%c0_282, %c56_283, %c0_284] : memref<1x80x128xf32, #tpu.memory_space<vmem>>, vector<1x1x128xf32>
    %569 = vector.shape_cast %568 : vector<1x1x128xf32> to vector<1x128xf32>
    %570 = vector.shape_cast %567 : vector<1x128xf32> to vector<1x1x128xf32>
    tpu.vector_store %arg4[%c0_282, %c56_283, %c0_284], %570 {strides = array<i32>} : memref<1x80x128xf32, #tpu.memory_space<vmem>>, vector<1x1x128xf32>,
    %c57_i32 = arith.constant 57 : i32
    %571 = arith.addi %0, %c57_i32 : i32
    %572 = arith.index_cast %571 : i32 to index
    %573 = memref.load %arg1[%572] : memref<160xi32, #tpu.memory_space<smem>>
    %574 = arith.index_cast %573 : i32 to index
    %c0_285 = arith.constant 0 : index
    %575 = vector.load %arg2[%574, %c0_285] : memref<512x128xf32, #tpu.memory_space<vmem>>, vector<1x128xf32>
    %c57 = arith.constant 57 : index
    %c0_286 = arith.constant 0 : index
    %576 = vector.load %arg3[%c57, %c0_286] : memref<80x128xf32, #tpu.memory_space<vmem>>, vector<1x128xf32>
    %577 = arith.addf %575, %576 : vector<1x128xf32>
    %c0_287 = arith.constant 0 : index
    %c57_288 = arith.constant 57 : index
    %c0_289 = arith.constant 0 : index
    %578 = vector.load %arg4[%c0_287, %c57_288, %c0_289] : memref<1x80x128xf32, #tpu.memory_space<vmem>>, vector<1x1x128xf32>
    %579 = vector.shape_cast %578 : vector<1x1x128xf32> to vector<1x128xf32>
    %580 = vector.shape_cast %577 : vector<1x128xf32> to vector<1x1x128xf32>
    tpu.vector_store %arg4[%c0_287, %c57_288, %c0_289], %580 {strides = array<i32>} : memref<1x80x128xf32, #tpu.memory_space<vmem>>, vector<1x1x128xf32>,
    %c58_i32 = arith.constant 58 : i32
    %581 = arith.addi %0, %c58_i32 : i32
    %582 = arith.index_cast %581 : i32 to index
    %583 = memref.load %arg1[%582] : memref<160xi32, #tpu.memory_space<smem>>
    %584 = arith.index_cast %583 : i32 to index
    %c0_290 = arith.constant 0 : index
    %585 = vector.load %arg2[%584, %c0_290] : memref<512x128xf32, #tpu.memory_space<vmem>>, vector<1x128xf32>
    %c58 = arith.constant 58 : index
    %c0_291 = arith.constant 0 : index
    %586 = vector.load %arg3[%c58, %c0_291] : memref<80x128xf32, #tpu.memory_space<vmem>>, vector<1x128xf32>
    %587 = arith.addf %585, %586 : vector<1x128xf32>
    %c0_292 = arith.constant 0 : index
    %c58_293 = arith.constant 58 : index
    %c0_294 = arith.constant 0 : index
    %588 = vector.load %arg4[%c0_292, %c58_293, %c0_294] : memref<1x80x128xf32, #tpu.memory_space<vmem>>, vector<1x1x128xf32>
    %589 = vector.shape_cast %588 : vector<1x1x128xf32> to vector<1x128xf32>
    %590 = vector.shape_cast %587 : vector<1x128xf32> to vector<1x1x128xf32>
    tpu.vector_store %arg4[%c0_292, %c58_293, %c0_294], %590 {strides = array<i32>} : memref<1x80x128xf32, #tpu.memory_space<vmem>>, vector<1x1x128xf32>,
    %c59_i32 = arith.constant 59 : i32
    %591 = arith.addi %0, %c59_i32 : i32
    %592 = arith.index_cast %591 : i32 to index
    %593 = memref.load %arg1[%592] : memref<160xi32, #tpu.memory_space<smem>>
    %594 = arith.index_cast %593 : i32 to index
    %c0_295 = arith.constant 0 : index
    %595 = vector.load %arg2[%594, %c0_295] : memref<512x128xf32, #tpu.memory_space<vmem>>, vector<1x128xf32>
    %c59 = arith.constant 59 : index
    %c0_296 = arith.constant 0 : index
    %596 = vector.load %arg3[%c59, %c0_296] : memref<80x128xf32, #tpu.memory_space<vmem>>, vector<1x128xf32>
    %597 = arith.addf %595, %596 : vector<1x128xf32>
    %c0_297 = arith.constant 0 : index
    %c59_298 = arith.constant 59 : index
    %c0_299 = arith.constant 0 : index
    %598 = vector.load %arg4[%c0_297, %c59_298, %c0_299] : memref<1x80x128xf32, #tpu.memory_space<vmem>>, vector<1x1x128xf32>
    %599 = vector.shape_cast %598 : vector<1x1x128xf32> to vector<1x128xf32>
    %600 = vector.shape_cast %597 : vector<1x128xf32> to vector<1x1x128xf32>
    tpu.vector_store %arg4[%c0_297, %c59_298, %c0_299], %600 {strides = array<i32>} : memref<1x80x128xf32, #tpu.memory_space<vmem>>, vector<1x1x128xf32>,
    %c60_i32 = arith.constant 60 : i32
    %601 = arith.addi %0, %c60_i32 : i32
    %602 = arith.index_cast %601 : i32 to index
    %603 = memref.load %arg1[%602] : memref<160xi32, #tpu.memory_space<smem>>
    %604 = arith.index_cast %603 : i32 to index
    %c0_300 = arith.constant 0 : index
    %605 = vector.load %arg2[%604, %c0_300] : memref<512x128xf32, #tpu.memory_space<vmem>>, vector<1x128xf32>
    %c60 = arith.constant 60 : index
    %c0_301 = arith.constant 0 : index
    %606 = vector.load %arg3[%c60, %c0_301] : memref<80x128xf32, #tpu.memory_space<vmem>>, vector<1x128xf32>
    %607 = arith.addf %605, %606 : vector<1x128xf32>
    %c0_302 = arith.constant 0 : index
    %c60_303 = arith.constant 60 : index
    %c0_304 = arith.constant 0 : index
    %608 = vector.load %arg4[%c0_302, %c60_303, %c0_304] : memref<1x80x128xf32, #tpu.memory_space<vmem>>, vector<1x1x128xf32>
    %609 = vector.shape_cast %608 : vector<1x1x128xf32> to vector<1x128xf32>
    %610 = vector.shape_cast %607 : vector<1x128xf32> to vector<1x1x128xf32>
    tpu.vector_store %arg4[%c0_302, %c60_303, %c0_304], %610 {strides = array<i32>} : memref<1x80x128xf32, #tpu.memory_space<vmem>>, vector<1x1x128xf32>,
    %c61_i32 = arith.constant 61 : i32
    %611 = arith.addi %0, %c61_i32 : i32
    %612 = arith.index_cast %611 : i32 to index
    %613 = memref.load %arg1[%612] : memref<160xi32, #tpu.memory_space<smem>>
    %614 = arith.index_cast %613 : i32 to index
    %c0_305 = arith.constant 0 : index
    %615 = vector.load %arg2[%614, %c0_305] : memref<512x128xf32, #tpu.memory_space<vmem>>, vector<1x128xf32>
    %c61 = arith.constant 61 : index
    %c0_306 = arith.constant 0 : index
    %616 = vector.load %arg3[%c61, %c0_306] : memref<80x128xf32, #tpu.memory_space<vmem>>, vector<1x128xf32>
    %617 = arith.addf %615, %616 : vector<1x128xf32>
    %c0_307 = arith.constant 0 : index
    %c61_308 = arith.constant 61 : index
    %c0_309 = arith.constant 0 : index
    %618 = vector.load %arg4[%c0_307, %c61_308, %c0_309] : memref<1x80x128xf32, #tpu.memory_space<vmem>>, vector<1x1x128xf32>
    %619 = vector.shape_cast %618 : vector<1x1x128xf32> to vector<1x128xf32>
    %620 = vector.shape_cast %617 : vector<1x128xf32> to vector<1x1x128xf32>
    tpu.vector_store %arg4[%c0_307, %c61_308, %c0_309], %620 {strides = array<i32>} : memref<1x80x128xf32, #tpu.memory_space<vmem>>, vector<1x1x128xf32>,
    %c62_i32 = arith.constant 62 : i32
    %621 = arith.addi %0, %c62_i32 : i32
    %622 = arith.index_cast %621 : i32 to index
    %623 = memref.load %arg1[%622] : memref<160xi32, #tpu.memory_space<smem>>
    %624 = arith.index_cast %623 : i32 to index
    %c0_310 = arith.constant 0 : index
    %625 = vector.load %arg2[%624, %c0_310] : memref<512x128xf32, #tpu.memory_space<vmem>>, vector<1x128xf32>
    %c62 = arith.constant 62 : index
    %c0_311 = arith.constant 0 : index
    %626 = vector.load %arg3[%c62, %c0_311] : memref<80x128xf32, #tpu.memory_space<vmem>>, vector<1x128xf32>
    %627 = arith.addf %625, %626 : vector<1x128xf32>
    %c0_312 = arith.constant 0 : index
    %c62_313 = arith.constant 62 : index
    %c0_314 = arith.constant 0 : index
    %628 = vector.load %arg4[%c0_312, %c62_313, %c0_314] : memref<1x80x128xf32, #tpu.memory_space<vmem>>, vector<1x1x128xf32>
    %629 = vector.shape_cast %628 : vector<1x1x128xf32> to vector<1x128xf32>
    %630 = vector.shape_cast %627 : vector<1x128xf32> to vector<1x1x128xf32>
    tpu.vector_store %arg4[%c0_312, %c62_313, %c0_314], %630 {strides = array<i32>} : memref<1x80x128xf32, #tpu.memory_space<vmem>>, vector<1x1x128xf32>,
    %c63_i32 = arith.constant 63 : i32
    %631 = arith.addi %0, %c63_i32 : i32
    %632 = arith.index_cast %631 : i32 to index
    %633 = memref.load %arg1[%632] : memref<160xi32, #tpu.memory_space<smem>>
    %634 = arith.index_cast %633 : i32 to index
    %c0_315 = arith.constant 0 : index
    %635 = vector.load %arg2[%634, %c0_315] : memref<512x128xf32, #tpu.memory_space<vmem>>, vector<1x128xf32>
    %c63 = arith.constant 63 : index
    %c0_316 = arith.constant 0 : index
    %636 = vector.load %arg3[%c63, %c0_316] : memref<80x128xf32, #tpu.memory_space<vmem>>, vector<1x128xf32>
    %637 = arith.addf %635, %636 : vector<1x128xf32>
    %c0_317 = arith.constant 0 : index
    %c63_318 = arith.constant 63 : index
    %c0_319 = arith.constant 0 : index
    %638 = vector.load %arg4[%c0_317, %c63_318, %c0_319] : memref<1x80x128xf32, #tpu.memory_space<vmem>>, vector<1x1x128xf32>
    %639 = vector.shape_cast %638 : vector<1x1x128xf32> to vector<1x128xf32>
    %640 = vector.shape_cast %637 : vector<1x128xf32> to vector<1x1x128xf32>
    tpu.vector_store %arg4[%c0_317, %c63_318, %c0_319], %640 {strides = array<i32>} : memref<1x80x128xf32, #tpu.memory_space<vmem>>, vector<1x1x128xf32>,
    %c64_i32 = arith.constant 64 : i32
    %641 = arith.addi %0, %c64_i32 : i32
    %642 = arith.index_cast %641 : i32 to index
    %643 = memref.load %arg1[%642] : memref<160xi32, #tpu.memory_space<smem>>
    %644 = arith.index_cast %643 : i32 to index
    %c0_320 = arith.constant 0 : index
    %645 = vector.load %arg2[%644, %c0_320] : memref<512x128xf32, #tpu.memory_space<vmem>>, vector<1x128xf32>
    %c64 = arith.constant 64 : index
    %c0_321 = arith.constant 0 : index
    %646 = vector.load %arg3[%c64, %c0_321] : memref<80x128xf32, #tpu.memory_space<vmem>>, vector<1x128xf32>
    %647 = arith.addf %645, %646 : vector<1x128xf32>
    %c0_322 = arith.constant 0 : index
    %c64_323 = arith.constant 64 : index
    %c0_324 = arith.constant 0 : index
    %648 = vector.load %arg4[%c0_322, %c64_323, %c0_324] : memref<1x80x128xf32, #tpu.memory_space<vmem>>, vector<1x1x128xf32>
    %649 = vector.shape_cast %648 : vector<1x1x128xf32> to vector<1x128xf32>
    %650 = vector.shape_cast %647 : vector<1x128xf32> to vector<1x1x128xf32>
    tpu.vector_store %arg4[%c0_322, %c64_323, %c0_324], %650 {strides = array<i32>} : memref<1x80x128xf32, #tpu.memory_space<vmem>>, vector<1x1x128xf32>,
    %c65_i32 = arith.constant 65 : i32
    %651 = arith.addi %0, %c65_i32 : i32
    %652 = arith.index_cast %651 : i32 to index
    %653 = memref.load %arg1[%652] : memref<160xi32, #tpu.memory_space<smem>>
    %654 = arith.index_cast %653 : i32 to index
    %c0_325 = arith.constant 0 : index
    %655 = vector.load %arg2[%654, %c0_325] : memref<512x128xf32, #tpu.memory_space<vmem>>, vector<1x128xf32>
    %c65 = arith.constant 65 : index
    %c0_326 = arith.constant 0 : index
    %656 = vector.load %arg3[%c65, %c0_326] : memref<80x128xf32, #tpu.memory_space<vmem>>, vector<1x128xf32>
    %657 = arith.addf %655, %656 : vector<1x128xf32>
    %c0_327 = arith.constant 0 : index
    %c65_328 = arith.constant 65 : index
    %c0_329 = arith.constant 0 : index
    %658 = vector.load %arg4[%c0_327, %c65_328, %c0_329] : memref<1x80x128xf32, #tpu.memory_space<vmem>>, vector<1x1x128xf32>
    %659 = vector.shape_cast %658 : vector<1x1x128xf32> to vector<1x128xf32>
    %660 = vector.shape_cast %657 : vector<1x128xf32> to vector<1x1x128xf32>
    tpu.vector_store %arg4[%c0_327, %c65_328, %c0_329], %660 {strides = array<i32>} : memref<1x80x128xf32, #tpu.memory_space<vmem>>, vector<1x1x128xf32>,
    %c66_i32 = arith.constant 66 : i32
    %661 = arith.addi %0, %c66_i32 : i32
    %662 = arith.index_cast %661 : i32 to index
    %663 = memref.load %arg1[%662] : memref<160xi32, #tpu.memory_space<smem>>
    %664 = arith.index_cast %663 : i32 to index
    %c0_330 = arith.constant 0 : index
    %665 = vector.load %arg2[%664, %c0_330] : memref<512x128xf32, #tpu.memory_space<vmem>>, vector<1x128xf32>
    %c66 = arith.constant 66 : index
    %c0_331 = arith.constant 0 : index
    %666 = vector.load %arg3[%c66, %c0_331] : memref<80x128xf32, #tpu.memory_space<vmem>>, vector<1x128xf32>
    %667 = arith.addf %665, %666 : vector<1x128xf32>
    %c0_332 = arith.constant 0 : index
    %c66_333 = arith.constant 66 : index
    %c0_334 = arith.constant 0 : index
    %668 = vector.load %arg4[%c0_332, %c66_333, %c0_334] : memref<1x80x128xf32, #tpu.memory_space<vmem>>, vector<1x1x128xf32>
    %669 = vector.shape_cast %668 : vector<1x1x128xf32> to vector<1x128xf32>
    %670 = vector.shape_cast %667 : vector<1x128xf32> to vector<1x1x128xf32>
    tpu.vector_store %arg4[%c0_332, %c66_333, %c0_334], %670 {strides = array<i32>} : memref<1x80x128xf32, #tpu.memory_space<vmem>>, vector<1x1x128xf32>,
    %c67_i32 = arith.constant 67 : i32
    %671 = arith.addi %0, %c67_i32 : i32
    %672 = arith.index_cast %671 : i32 to index
    %673 = memref.load %arg1[%672] : memref<160xi32, #tpu.memory_space<smem>>
    %674 = arith.index_cast %673 : i32 to index
    %c0_335 = arith.constant 0 : index
    %675 = vector.load %arg2[%674, %c0_335] : memref<512x128xf32, #tpu.memory_space<vmem>>, vector<1x128xf32>
    %c67 = arith.constant 67 : index
    %c0_336 = arith.constant 0 : index
    %676 = vector.load %arg3[%c67, %c0_336] : memref<80x128xf32, #tpu.memory_space<vmem>>, vector<1x128xf32>
    %677 = arith.addf %675, %676 : vector<1x128xf32>
    %c0_337 = arith.constant 0 : index
    %c67_338 = arith.constant 67 : index
    %c0_339 = arith.constant 0 : index
    %678 = vector.load %arg4[%c0_337, %c67_338, %c0_339] : memref<1x80x128xf32, #tpu.memory_space<vmem>>, vector<1x1x128xf32>
    %679 = vector.shape_cast %678 : vector<1x1x128xf32> to vector<1x128xf32>
    %680 = vector.shape_cast %677 : vector<1x128xf32> to vector<1x1x128xf32>
    tpu.vector_store %arg4[%c0_337, %c67_338, %c0_339], %680 {strides = array<i32>} : memref<1x80x128xf32, #tpu.memory_space<vmem>>, vector<1x1x128xf32>,
    %c68_i32 = arith.constant 68 : i32
    %681 = arith.addi %0, %c68_i32 : i32
    %682 = arith.index_cast %681 : i32 to index
    %683 = memref.load %arg1[%682] : memref<160xi32, #tpu.memory_space<smem>>
    %684 = arith.index_cast %683 : i32 to index
    %c0_340 = arith.constant 0 : index
    %685 = vector.load %arg2[%684, %c0_340] : memref<512x128xf32, #tpu.memory_space<vmem>>, vector<1x128xf32>
    %c68 = arith.constant 68 : index
    %c0_341 = arith.constant 0 : index
    %686 = vector.load %arg3[%c68, %c0_341] : memref<80x128xf32, #tpu.memory_space<vmem>>, vector<1x128xf32>
    %687 = arith.addf %685, %686 : vector<1x128xf32>
    %c0_342 = arith.constant 0 : index
    %c68_343 = arith.constant 68 : index
    %c0_344 = arith.constant 0 : index
    %688 = vector.load %arg4[%c0_342, %c68_343, %c0_344] : memref<1x80x128xf32, #tpu.memory_space<vmem>>, vector<1x1x128xf32>
    %689 = vector.shape_cast %688 : vector<1x1x128xf32> to vector<1x128xf32>
    %690 = vector.shape_cast %687 : vector<1x128xf32> to vector<1x1x128xf32>
    tpu.vector_store %arg4[%c0_342, %c68_343, %c0_344], %690 {strides = array<i32>} : memref<1x80x128xf32, #tpu.memory_space<vmem>>, vector<1x1x128xf32>,
    %c69_i32 = arith.constant 69 : i32
    %691 = arith.addi %0, %c69_i32 : i32
    %692 = arith.index_cast %691 : i32 to index
    %693 = memref.load %arg1[%692] : memref<160xi32, #tpu.memory_space<smem>>
    %694 = arith.index_cast %693 : i32 to index
    %c0_345 = arith.constant 0 : index
    %695 = vector.load %arg2[%694, %c0_345] : memref<512x128xf32, #tpu.memory_space<vmem>>, vector<1x128xf32>
    %c69 = arith.constant 69 : index
    %c0_346 = arith.constant 0 : index
    %696 = vector.load %arg3[%c69, %c0_346] : memref<80x128xf32, #tpu.memory_space<vmem>>, vector<1x128xf32>
    %697 = arith.addf %695, %696 : vector<1x128xf32>
    %c0_347 = arith.constant 0 : index
    %c69_348 = arith.constant 69 : index
    %c0_349 = arith.constant 0 : index
    %698 = vector.load %arg4[%c0_347, %c69_348, %c0_349] : memref<1x80x128xf32, #tpu.memory_space<vmem>>, vector<1x1x128xf32>
    %699 = vector.shape_cast %698 : vector<1x1x128xf32> to vector<1x128xf32>
    %700 = vector.shape_cast %697 : vector<1x128xf32> to vector<1x1x128xf32>
    tpu.vector_store %arg4[%c0_347, %c69_348, %c0_349], %700 {strides = array<i32>} : memref<1x80x128xf32, #tpu.memory_space<vmem>>, vector<1x1x128xf32>,
    %c70_i32 = arith.constant 70 : i32
    %701 = arith.addi %0, %c70_i32 : i32
    %702 = arith.index_cast %701 : i32 to index
    %703 = memref.load %arg1[%702] : memref<160xi32, #tpu.memory_space<smem>>
    %704 = arith.index_cast %703 : i32 to index
    %c0_350 = arith.constant 0 : index
    %705 = vector.load %arg2[%704, %c0_350] : memref<512x128xf32, #tpu.memory_space<vmem>>, vector<1x128xf32>
    %c70 = arith.constant 70 : index
    %c0_351 = arith.constant 0 : index
    %706 = vector.load %arg3[%c70, %c0_351] : memref<80x128xf32, #tpu.memory_space<vmem>>, vector<1x128xf32>
    %707 = arith.addf %705, %706 : vector<1x128xf32>
    %c0_352 = arith.constant 0 : index
    %c70_353 = arith.constant 70 : index
    %c0_354 = arith.constant 0 : index
    %708 = vector.load %arg4[%c0_352, %c70_353, %c0_354] : memref<1x80x128xf32, #tpu.memory_space<vmem>>, vector<1x1x128xf32>
    %709 = vector.shape_cast %708 : vector<1x1x128xf32> to vector<1x128xf32>
    %710 = vector.shape_cast %707 : vector<1x128xf32> to vector<1x1x128xf32>
    tpu.vector_store %arg4[%c0_352, %c70_353, %c0_354], %710 {strides = array<i32>} : memref<1x80x128xf32, #tpu.memory_space<vmem>>, vector<1x1x128xf32>,
    %c71_i32 = arith.constant 71 : i32
    %711 = arith.addi %0, %c71_i32 : i32
    %712 = arith.index_cast %711 : i32 to index
    %713 = memref.load %arg1[%712] : memref<160xi32, #tpu.memory_space<smem>>
    %714 = arith.index_cast %713 : i32 to index
    %c0_355 = arith.constant 0 : index
    %715 = vector.load %arg2[%714, %c0_355] : memref<512x128xf32, #tpu.memory_space<vmem>>, vector<1x128xf32>
    %c71 = arith.constant 71 : index
    %c0_356 = arith.constant 0 : index
    %716 = vector.load %arg3[%c71, %c0_356] : memref<80x128xf32, #tpu.memory_space<vmem>>, vector<1x128xf32>
    %717 = arith.addf %715, %716 : vector<1x128xf32>
    %c0_357 = arith.constant 0 : index
    %c71_358 = arith.constant 71 : index
    %c0_359 = arith.constant 0 : index
    %718 = vector.load %arg4[%c0_357, %c71_358, %c0_359] : memref<1x80x128xf32, #tpu.memory_space<vmem>>, vector<1x1x128xf32>
    %719 = vector.shape_cast %718 : vector<1x1x128xf32> to vector<1x128xf32>
    %720 = vector.shape_cast %717 : vector<1x128xf32> to vector<1x1x128xf32>
    tpu.vector_store %arg4[%c0_357, %c71_358, %c0_359], %720 {strides = array<i32>} : memref<1x80x128xf32, #tpu.memory_space<vmem>>, vector<1x1x128xf32>,
    %c72_i32 = arith.constant 72 : i32
    %721 = arith.addi %0, %c72_i32 : i32
    %722 = arith.index_cast %721 : i32 to index
    %723 = memref.load %arg1[%722] : memref<160xi32, #tpu.memory_space<smem>>
    %724 = arith.index_cast %723 : i32 to index
    %c0_360 = arith.constant 0 : index
    %725 = vector.load %arg2[%724, %c0_360] : memref<512x128xf32, #tpu.memory_space<vmem>>, vector<1x128xf32>
    %c72 = arith.constant 72 : index
    %c0_361 = arith.constant 0 : index
    %726 = vector.load %arg3[%c72, %c0_361] : memref<80x128xf32, #tpu.memory_space<vmem>>, vector<1x128xf32>
    %727 = arith.addf %725, %726 : vector<1x128xf32>
    %c0_362 = arith.constant 0 : index
    %c72_363 = arith.constant 72 : index
    %c0_364 = arith.constant 0 : index
    %728 = vector.load %arg4[%c0_362, %c72_363, %c0_364] : memref<1x80x128xf32, #tpu.memory_space<vmem>>, vector<1x1x128xf32>
    %729 = vector.shape_cast %728 : vector<1x1x128xf32> to vector<1x128xf32>
    %730 = vector.shape_cast %727 : vector<1x128xf32> to vector<1x1x128xf32>
    tpu.vector_store %arg4[%c0_362, %c72_363, %c0_364], %730 {strides = array<i32>} : memref<1x80x128xf32, #tpu.memory_space<vmem>>, vector<1x1x128xf32>,
    %c73_i32 = arith.constant 73 : i32
    %731 = arith.addi %0, %c73_i32 : i32
    %732 = arith.index_cast %731 : i32 to index
    %733 = memref.load %arg1[%732] : memref<160xi32, #tpu.memory_space<smem>>
    %734 = arith.index_cast %733 : i32 to index
    %c0_365 = arith.constant 0 : index
    %735 = vector.load %arg2[%734, %c0_365] : memref<512x128xf32, #tpu.memory_space<vmem>>, vector<1x128xf32>
    %c73 = arith.constant 73 : index
    %c0_366 = arith.constant 0 : index
    %736 = vector.load %arg3[%c73, %c0_366] : memref<80x128xf32, #tpu.memory_space<vmem>>, vector<1x128xf32>
    %737 = arith.addf %735, %736 : vector<1x128xf32>
    %c0_367 = arith.constant 0 : index
    %c73_368 = arith.constant 73 : index
    %c0_369 = arith.constant 0 : index
    %738 = vector.load %arg4[%c0_367, %c73_368, %c0_369] : memref<1x80x128xf32, #tpu.memory_space<vmem>>, vector<1x1x128xf32>
    %739 = vector.shape_cast %738 : vector<1x1x128xf32> to vector<1x128xf32>
    %740 = vector.shape_cast %737 : vector<1x128xf32> to vector<1x1x128xf32>
    tpu.vector_store %arg4[%c0_367, %c73_368, %c0_369], %740 {strides = array<i32>} : memref<1x80x128xf32, #tpu.memory_space<vmem>>, vector<1x1x128xf32>,
    %c74_i32 = arith.constant 74 : i32
    %741 = arith.addi %0, %c74_i32 : i32
    %742 = arith.index_cast %741 : i32 to index
    %743 = memref.load %arg1[%742] : memref<160xi32, #tpu.memory_space<smem>>
    %744 = arith.index_cast %743 : i32 to index
    %c0_370 = arith.constant 0 : index
    %745 = vector.load %arg2[%744, %c0_370] : memref<512x128xf32, #tpu.memory_space<vmem>>, vector<1x128xf32>
    %c74 = arith.constant 74 : index
    %c0_371 = arith.constant 0 : index
    %746 = vector.load %arg3[%c74, %c0_371] : memref<80x128xf32, #tpu.memory_space<vmem>>, vector<1x128xf32>
    %747 = arith.addf %745, %746 : vector<1x128xf32>
    %c0_372 = arith.constant 0 : index
    %c74_373 = arith.constant 74 : index
    %c0_374 = arith.constant 0 : index
    %748 = vector.load %arg4[%c0_372, %c74_373, %c0_374] : memref<1x80x128xf32, #tpu.memory_space<vmem>>, vector<1x1x128xf32>
    %749 = vector.shape_cast %748 : vector<1x1x128xf32> to vector<1x128xf32>
    %750 = vector.shape_cast %747 : vector<1x128xf32> to vector<1x1x128xf32>
    tpu.vector_store %arg4[%c0_372, %c74_373, %c0_374], %750 {strides = array<i32>} : memref<1x80x128xf32, #tpu.memory_space<vmem>>, vector<1x1x128xf32>,
    %c75_i32 = arith.constant 75 : i32
    %751 = arith.addi %0, %c75_i32 : i32
    %752 = arith.index_cast %751 : i32 to index
    %753 = memref.load %arg1[%752] : memref<160xi32, #tpu.memory_space<smem>>
    %754 = arith.index_cast %753 : i32 to index
    %c0_375 = arith.constant 0 : index
    %755 = vector.load %arg2[%754, %c0_375] : memref<512x128xf32, #tpu.memory_space<vmem>>, vector<1x128xf32>
    %c75 = arith.constant 75 : index
    %c0_376 = arith.constant 0 : index
    %756 = vector.load %arg3[%c75, %c0_376] : memref<80x128xf32, #tpu.memory_space<vmem>>, vector<1x128xf32>
    %757 = arith.addf %755, %756 : vector<1x128xf32>
    %c0_377 = arith.constant 0 : index
    %c75_378 = arith.constant 75 : index
    %c0_379 = arith.constant 0 : index
    %758 = vector.load %arg4[%c0_377, %c75_378, %c0_379] : memref<1x80x128xf32, #tpu.memory_space<vmem>>, vector<1x1x128xf32>
    %759 = vector.shape_cast %758 : vector<1x1x128xf32> to vector<1x128xf32>
    %760 = vector.shape_cast %757 : vector<1x128xf32> to vector<1x1x128xf32>
    tpu.vector_store %arg4[%c0_377, %c75_378, %c0_379], %760 {strides = array<i32>} : memref<1x80x128xf32, #tpu.memory_space<vmem>>, vector<1x1x128xf32>,
    %c76_i32 = arith.constant 76 : i32
    %761 = arith.addi %0, %c76_i32 : i32
    %762 = arith.index_cast %761 : i32 to index
    %763 = memref.load %arg1[%762] : memref<160xi32, #tpu.memory_space<smem>>
    %764 = arith.index_cast %763 : i32 to index
    %c0_380 = arith.constant 0 : index
    %765 = vector.load %arg2[%764, %c0_380] : memref<512x128xf32, #tpu.memory_space<vmem>>, vector<1x128xf32>
    %c76 = arith.constant 76 : index
    %c0_381 = arith.constant 0 : index
    %766 = vector.load %arg3[%c76, %c0_381] : memref<80x128xf32, #tpu.memory_space<vmem>>, vector<1x128xf32>
    %767 = arith.addf %765, %766 : vector<1x128xf32>
    %c0_382 = arith.constant 0 : index
    %c76_383 = arith.constant 76 : index
    %c0_384 = arith.constant 0 : index
    %768 = vector.load %arg4[%c0_382, %c76_383, %c0_384] : memref<1x80x128xf32, #tpu.memory_space<vmem>>, vector<1x1x128xf32>
    %769 = vector.shape_cast %768 : vector<1x1x128xf32> to vector<1x128xf32>
    %770 = vector.shape_cast %767 : vector<1x128xf32> to vector<1x1x128xf32>
    tpu.vector_store %arg4[%c0_382, %c76_383, %c0_384], %770 {strides = array<i32>} : memref<1x80x128xf32, #tpu.memory_space<vmem>>, vector<1x1x128xf32>,
    %c77_i32 = arith.constant 77 : i32
    %771 = arith.addi %0, %c77_i32 : i32
    %772 = arith.index_cast %771 : i32 to index
    %773 = memref.load %arg1[%772] : memref<160xi32, #tpu.memory_space<smem>>
    %774 = arith.index_cast %773 : i32 to index
    %c0_385 = arith.constant 0 : index
    %775 = vector.load %arg2[%774, %c0_385] : memref<512x128xf32, #tpu.memory_space<vmem>>, vector<1x128xf32>
    %c77 = arith.constant 77 : index
    %c0_386 = arith.constant 0 : index
    %776 = vector.load %arg3[%c77, %c0_386] : memref<80x128xf32, #tpu.memory_space<vmem>>, vector<1x128xf32>
    %777 = arith.addf %775, %776 : vector<1x128xf32>
    %c0_387 = arith.constant 0 : index
    %c77_388 = arith.constant 77 : index
    %c0_389 = arith.constant 0 : index
    %778 = vector.load %arg4[%c0_387, %c77_388, %c0_389] : memref<1x80x128xf32, #tpu.memory_space<vmem>>, vector<1x1x128xf32>
    %779 = vector.shape_cast %778 : vector<1x1x128xf32> to vector<1x128xf32>
    %780 = vector.shape_cast %777 : vector<1x128xf32> to vector<1x1x128xf32>
    tpu.vector_store %arg4[%c0_387, %c77_388, %c0_389], %780 {strides = array<i32>} : memref<1x80x128xf32, #tpu.memory_space<vmem>>, vector<1x1x128xf32>,
    %c78_i32 = arith.constant 78 : i32
    %781 = arith.addi %0, %c78_i32 : i32
    %782 = arith.index_cast %781 : i32 to index
    %783 = memref.load %arg1[%782] : memref<160xi32, #tpu.memory_space<smem>>
    %784 = arith.index_cast %783 : i32 to index
    %c0_390 = arith.constant 0 : index
    %785 = vector.load %arg2[%784, %c0_390] : memref<512x128xf32, #tpu.memory_space<vmem>>, vector<1x128xf32>
    %c78 = arith.constant 78 : index
    %c0_391 = arith.constant 0 : index
    %786 = vector.load %arg3[%c78, %c0_391] : memref<80x128xf32, #tpu.memory_space<vmem>>, vector<1x128xf32>
    %787 = arith.addf %785, %786 : vector<1x128xf32>
    %c0_392 = arith.constant 0 : index
    %c78_393 = arith.constant 78 : index
    %c0_394 = arith.constant 0 : index
    %788 = vector.load %arg4[%c0_392, %c78_393, %c0_394] : memref<1x80x128xf32, #tpu.memory_space<vmem>>, vector<1x1x128xf32>
    %789 = vector.shape_cast %788 : vector<1x1x128xf32> to vector<1x128xf32>
    %790 = vector.shape_cast %787 : vector<1x128xf32> to vector<1x1x128xf32>
    tpu.vector_store %arg4[%c0_392, %c78_393, %c0_394], %790 {strides = array<i32>} : memref<1x80x128xf32, #tpu.memory_space<vmem>>, vector<1x1x128xf32>,
    %c79_i32 = arith.constant 79 : i32
    %791 = arith.addi %0, %c79_i32 : i32
    %792 = arith.index_cast %791 : i32 to index
    %793 = memref.load %arg1[%792] : memref<160xi32, #tpu.memory_space<smem>>
    %794 = arith.index_cast %793 : i32 to index
    %c0_395 = arith.constant 0 : index
    %795 = vector.load %arg2[%794, %c0_395] : memref<512x128xf32, #tpu.memory_space<vmem>>, vector<1x128xf32>
    %c79 = arith.constant 79 : index
    %c0_396 = arith.constant 0 : index
    %796 = vector.load %arg3[%c79, %c0_396] : memref<80x128xf32, #tpu.memory_space<vmem>>, vector<1x128xf32>
    %797 = arith.addf %795, %796 : vector<1x128xf32>
    %c0_397 = arith.constant 0 : index
    %c79_398 = arith.constant 79 : index
    %c0_399 = arith.constant 0 : index
    %798 = vector.load %arg4[%c0_397, %c79_398, %c0_399] : memref<1x80x128xf32, #tpu.memory_space<vmem>>, vector<1x1x128xf32>
    %799 = vector.shape_cast %798 : vector<1x1x128xf32> to vector<1x128xf32>
    %800 = vector.shape_cast %797 : vector<1x128xf32> to vector<1x1x128xf32>
    tpu.vector_store %arg4[%c0_397, %c79_398, %c0_399], %800 {strides = array<i32>} : memref<1x80x128xf32, #tpu.memory_space<vmem>>, vector<1x1x128xf32>,
    return
  }
  func.func @transform_0(%arg0: i32, %arg1: memref<160xi32, #tpu.memory_space<smem>>) -> (i32, i32) {
    %c0_i32 = arith.constant 0 : i32
    %c0_i32_0 = arith.constant 0 : i32
    %c0_i32_1 = arith.constant 0 : i32
    return %c0_i32, %c0_i32_0 : i32, i32
  }
  func.func @transform_1(%arg0: i32, %arg1: memref<160xi32, #tpu.memory_space<smem>>) -> (i32, i32) {
    %c0_i32 = arith.constant 0 : i32
    %c0_i32_0 = arith.constant 0 : i32
    %c0_i32_1 = arith.constant 0 : i32
    return %c0_i32, %c0_i32_0 : i32, i32
  }
  func.func @transform_2(%arg0: i32, %arg1: memref<160xi32, #tpu.memory_space<smem>>) -> (i32, i32, i32) {
    %c0_i32 = arith.constant 0 : i32
    %c0_i32_0 = arith.constant 0 : i32
    %c0_i32_1 = arith.constant 0 : i32
    return %arg0, %c0_i32, %c0_i32_0 : i32, i32, i32
  }
}

</mosaic_0001>

<bundles_post_ra>
// kernel: tpu_custom_call.1
= control target key start
LH: loop header
LB: loop body
LE: loop exit
PB: predicated region body
PF: predicated region fallthrough
CT: control target
= control target key end

     0   :  { %s1702_s0 = inlined_call_operand.hbm [shape: s32[160], index: 0, kind: input, shape index: {}]   ;;  %s1703_s1 = inlined_call_operand.hbm [shape: f32[512,128], index: 1, kind: input, shape index: {}]   ;;  %s1704_s2 = inlined_call_operand.hbm [shape: f32[80,128], index: 2, kind: input, shape index: {}]   ;;  %s1705_s3 = inlined_call_operand.hbm [shape: f32[2,80,128], index: 3, kind: output, shape index: {}]  }
   0x1   :  { %s960_s14 = scalar_lea.hbm %s1702_s0, 32 }
   0x2   :  { %p961_p0 = scmp.ne.s32.totalorder %s1702_s0, %s960_s14  ;;  %p964_p1 = scmp.lt.u32.totalorder %s960_s14, %s1702_s0 }
   0x4   :  { %p966_p2 = pnand %p964_p1, %p961_p0 }
   0x6   :  { %969 = shalt.err (!%p966_p2)  }
   0x7   :  { %s1100_s19 = smov [#allocation3]  }
   0x8   :  { %9 = dma.hbm_to_smem %s1702_s0, 32, %s1100_s19, [#allocation2] }
   0x9   :  { %1070 = dma.done.wait [#allocation2], 32 }
   0xa   :  { %1071 = vsyncadd [#allocation2], 4294967264 }
   0xb   :  { %11 = sfence }
   0xc   :  { %12 = vsyncpa [#allocation5], 0 }
   0xd   :  { %13 = vsyncpa [#allocation8], 0 }
   0xe   :  { %14 = vsyncpa [#allocation6], 0 }
   0xf   :  { %16 = vsyncpa [#allocation6 + $0x1], 0  ;;  %s1140_s22 = smov 0   ;;  %s1142_s23 = smov 0  }
  0x10   :  { %s1144_s24 = smov 0   ;;  %s1146_s25 = smov 0  }
  0x11 LB: > { %s1161_s0 = sadd.s32 4294967295, %s1098_s25   ;;  %s883_s26 = sadd.s32 4294967294, %s1098_s25   ;;  %s1098_s25 = sphi %s1146_s25, %s1723_s25   ;;  %s1094_s24 = sphi %s1144_s24, %s1722_s24   ;;  %s1090_s23 = sphi %s1142_s23, %s1721_s23   ;;  %s1086_s22 = sphi %s1140_s22, %s1720_s22  }
  0x12   : > { %s1165_s27 = sadd.s32 1, %s1098_s25   ;;  %s71_s28 = sadd.s32 1, %s1094_s24 }
  0x13   : > { %s68_s29 = ssub.s32 %s1098_s25, %s1165_s27  ;;  %p81_p3 = scmp.ne.s32.totalorder %s1094_s24, %s1090_s23 }
  0x14   : > { %p69_p4 = scmp.eq.s32.totalorder %s68_s29, 0  ;;  %p82_p5 = scmp.eq.s32.totalorder %s1161_s0, 1 }
  0x15   : > { %p87_p6 = scmp.ne.s32.totalorder %s1090_s23, %s1086_s22  ;;  %p88_p7 = scmp.eq.s32.totalorder %s883_s26, 1 }
  0x16   : > { %s1176_s30 = scalar_select %p69_p4, %s1094_s24, %s71_s28  }
  0x17   : > { %p1178_p8 = por %p82_p5, %p81_p3  ;;  %p1182_p9 = por %p88_p7, %p87_p6 }
  0x18   : > { %p884_p10 = scmp.ge.s32.totalorder %s1098_s25, 1  ;;  %p95_p11 = scmp.lt.s32.totalorder %s1098_s25, 3 }
  0x19   : > { %s1709_s4 = scalar_select %p1178_p8, 1, 0 }
  0x1a   : > { %s1710_s5 = scalar_select %p1182_p9, 1, 0 }
  0x1b   : > { %p1706_p12 = scmp.eq.s32.totalorder %s1161_s0, 0  ;;  %p1189_p13 = pnand %p884_p10, %p95_p11 }
  0x1c   : > { %s1101_s7 = smov [#allocation4]   ;;  %s1102_s10 = smov [#allocation7]  }
  0x1d   : > { %s1711_s6 = scalar_select %p1189_p13, 1, 0 }
  0x1e   : > { %s107_s8 = sshll.u32 %s1101_s7, 4  ;;  %p905_p0 = pneg %p1189_p13  ;;  %s108_s8 = int_to_ptr.vmem [resolvable:$true] %s107_s8 }
  0x1f   : > { %s120_s11 = sshll.u32 %s1102_s10, 4  ;;  %s970_s14 = scalar_lea.hbm %s1703_s1, 8192  ;;  %s1201_s11 = int_to_ptr.vmem [resolvable:$true] %s120_s11 }
  0x20   : > { %p1197_p1 = pnand %p1706_p12, %p905_p0  ;;  %p971_p2 = scmp.ne.s32.totalorder %s1703_s1, %s970_s14 }
  0x21   : > { %p977_p6 = scmp.lt.u32.totalorder %s970_s14, %s1703_s1 }
  0x22   : > { %p972_p3 = pneg %p1197_p1 }
  0x24   : > { %p973_p4 = pnand %p972_p3, %p971_p2 }
  0x26   : > { %p974_p5 = pneg %p973_p4 }
  0x28   : > { %p979_p7 = pnand %p977_p6, %p974_p5 }
  0x2a   : > { %982 = shalt.err (!%p979_p7)
}
  0x2b   : > { %s983_s19 = scalar_lea.vmem %s108_s8, 8192  ;;  %p991_p12 = scmp.lt.s32.totalorder %s108_s8, %s108_s8 }
  0x2c   : > { %p984_p10 = scmp.ne.s32.totalorder %s108_s8, %s983_s19  ;;  %p992_p9 = scmp.lt.s32.totalorder %s983_s19, %s983_s19 }
  0x2e   : > { %p986_p11 = pnand %p984_p10, %p972_p3  ;;  %p993_p8 = por %p992_p9, %p991_p12 }
  0x30   : > { %p987_p0 = pneg %p986_p11 }
  0x32   : > { %p994_p13 = pnand %p993_p8, %p987_p0 }
  0x34   : > { %997 = shalt.err (!%p994_p13)
}
  0x35   : > { %s1103_s20 = smov 128   ;;  %s1104_s21 = smov 8  }
  0x36   : > { %908 = dma.hbm_to_vmem [thread:$0]  (!%p1197_p1), %s1703_s1, 8192, %s108_s8, [#allocation5], %s1103_s20, %s1103_s20, %s1104_s21  }
  0x37   : > { %s998_s10 = scalar_lea.hbm %s1704_s2, 1280 }
  0x38   : > { %p999_p2 = scmp.ne.s32.totalorder %s1704_s2, %s998_s10  ;;  %p1005_p12 = scmp.lt.u32.totalorder %s998_s10, %s1704_s2 }
  0x3a   : > { %p1001_p8 = pnand %p999_p2, %p972_p3 }
  0x3c   : > { %p1002_p9 = pneg %p1001_p8 }
  0x3e   : > { %p1007_p13 = pnand %p1005_p12, %p1002_p9 }
  0x40   : > { %1010 = shalt.err (!%p1007_p13)
}
  0x41   : > { %s1011_s8 = scalar_lea.vmem %s1201_s11, 1280  ;;  %p1019_p7 = scmp.lt.s32.totalorder %s1201_s11, %s1201_s11 }
  0x42   : > { %p1012_p4 = scmp.ne.s32.totalorder %s1201_s11, %s1011_s8  ;;  %p1020_p10 = scmp.lt.s32.totalorder %s1011_s8, %s1011_s8 }
  0x44   : > { %p1014_p5 = pnand %p1012_p4, %p972_p3  ;;  %p1021_p11 = por %p1020_p10, %p1019_p7 }
  0x46   : > { %p1015_p6 = pneg %p1014_p5 }
  0x48   : > { %p1022_p0 = pnand %p1021_p11, %p1015_p6 }
  0x4a   : > { %1025 = shalt.err (!%p1022_p0)
}
  0x4b   : > { %911 = dma.hbm_to_vmem [thread:$0]  (!%p1197_p1), %s1704_s2, 1280, %s1201_s11, [#allocation8], %s1103_s20, %s1103_s20, %s1104_s21  }
  0x4c   : > { %p1713_p2 = scmp.ne.s32.totalorder %s1711_s6, 0 }
  0x4d   : > { %p1714_p8 = scmp.eq.s32.totalorder (!%p1713_p2), %s1161_s0, 0 }
  0x4e   : > { %136 = sbr.rel (%p1713_p2) target bundleno = 237 (0xed), region = 28 }
  0x55   : > { %1073 = dma.done.wait (%p1714_p8), [#allocation5], 8192   ;;  %p1715_p3 = pmov %p1714_p8 }
  0x57   : > { %1075 = vsyncadd (%p1715_p3), [#allocation5], 4294959104  ;;  %p1716_p9 = pmov %p1715_p3 }
  0x58   : > { %p1717_p12 = pmov %p1715_p3 }
  0x59   : > { %1077 = dma.done.wait (%p1716_p9), [#allocation8], 1280  }
  0x5a   : > { %1079 = vsyncadd (%p1717_p12), [#allocation8], 4294966016  ;;  %s154_s9 = sand.u32 1, %s1090_s23   ;;  %s1262_s11 = smul.u32 80, %s1161_s0  ;;  %v161_v0 = vld [vmem:[#allocation7] sm:$0x1] }
  0x5b   : > { %s893_s19 = smul.u32 80, %s154_s9  ;;  %v168_v1 = vld [vmem:[#allocation7 + $0x1] sm:$0x1]  ;;  %v175_v3 = vld [vmem:[#allocation7 + $0x2] sm:$0x1]  ;;  %p1718_p13 = scmp.ne.s32.totalorder %s1709_s4, 0 }
  0x5c   : > { %s158_s6 = sld [smem:[#allocation3 + %s1262_s11]]  ;;  %s164_s18 = sadd.s32 1, %s1262_s11  ;;  %v182_v6 = vld [vmem:[#allocation7 + $0x3] sm:$0x1]  ;;  %v189_v12 = vld [vmem:[#allocation7 + $0x4] sm:$0x1] }
  0x5d   : > { %s165_s20 = sld [smem:[#allocation3 + %s164_s18]]  ;;  %s171_s21 = sadd.s32 2, %s1262_s11  ;;  %v196_v13 = vld [vmem:[#allocation7 + $0x5] sm:$0x1]  ;;  %v203_v18 = vld [vmem:[#allocation7 + $0x6] sm:$0x1] }
  0x5e   : > { %s178_s26 = sadd.s32 3, %s1262_s11  ;;  %s172_s28 = sld [smem:[#allocation3 + %s171_s21]]  ;;  %v210_v19 = vld [vmem:[#allocation7 + $0x7] sm:$0x1]  ;;  %v217_v20 = vld [vmem:[#allocation7 + $0x8] sm:$0x1] }
  0x5f   : > { %s179_s29 = sld [smem:[#allocation3 + %s178_s26]]  ;;  %s185_s7 = sadd.s32 4, %s1262_s11  ;;  %v224_v25 = vld [vmem:[#allocation7 + $0x9] sm:$0x1]  ;;  %v231_v27 = vld [vmem:[#allocation7 + $0xa] sm:$0x1] }
  0x60   : > { %s192_s10 = sadd.s32 5, %s1262_s11  ;;  %s1272_s12 = sld [smem:[#allocation3 + %s185_s7]]  ;;  %v238_v30 = vld [vmem:[#allocation7 + $0xb] sm:$0x1]  ;;  %v245_v36 = vld [vmem:[#allocation7 + $0xc] sm:$0x1] }
  0x61   : > { %s1274_s14 = sld [smem:[#allocation3 + %s192_s10]]  ;;  %s199_s8 = sadd.s32 6, %s1262_s11  ;;  %v252_v37 = vld [vmem:[#allocation7 + $0xd] sm:$0x1]  ;;  %v259_v42 = vld [vmem:[#allocation7 + $0xe] sm:$0x1] }
  0x62   : > { %s159_s13 = scalar_lea.vmem [#allocation4], %s158_s6  ;;  %s206_s16 = sadd.s32 7, %s1262_s11  ;;  %v266_v43 = vld [vmem:[#allocation7 + $0xf] sm:$0x1]  ;;  %v273_v44 = vld [vmem:[#allocation7 + $0x10] sm:$0x1] }
  0x63   : > { %v160_v2 = vld [vmem:[%s159_s13] sm:$0x1]  ;;  %s166_s15 = scalar_lea.vmem [#allocation4], %s165_s20  ;;  %s1278_s17 = scalar_lea.vmem [#allocation9], %s893_s19  ;;  %v280_v49 = vld [vmem:[#allocation7 + $0x11] sm:$0x1] }
  0x64   : > { %v162_v4 = vadd.f32 %v161_v0, %v160_v2  ;;  %v167_v5 = vld [vmem:[%s166_s15] sm:$0x1]  ;;  %s173_s6 = scalar_lea.vmem [#allocation4], %s172_s28  ;;  %s1281_s20 = sld [smem:[#allocation3 + %s199_s8]]  ;;  %v287_v51 = vld [vmem:[#allocation7 + $0x12] sm:$0x1] }
  0x65   : > { %v169_v7 = vadd.f32 %v168_v1, %v167_v5  ;;  %v174_v8 = vld [vmem:[%s173_s6] sm:$0x1]  ;;  %s180_s18 = scalar_lea.vmem [#allocation4], %s179_s29  ;;  %s1283_s21 = sld [smem:[#allocation3 + %s206_s16]]  ;;  %v294_v54 = vld [vmem:[#allocation7 + $0x13] sm:$0x1] }
  0x66   : > { %163 = vst [vmem:[%s1278_s17] sm:$0x1] %v162_v4  ;;  %v181_v9 = vld [vmem:[%s180_s18] sm:$0x1]  ;;  %v176_v10 = vadd.f32 %v175_v3, %v174_v8  ;;  %s213_s19 = sadd.s32 8, %s1262_s11  ;;  %s220_s26 = sadd.s32 9, %s1262_s11 }
  0x67   : > { %170 = vst [vmem:[%s1278_s17 + $0x1] sm:$0x1] %v169_v7  ;;  %v183_v11 = vadd.f32 %v182_v6, %v181_v9  ;;  %s1288_s7 = sld [smem:[#allocation3 + %s213_s19]]  ;;  %s187_s28 = scalar_lea.vmem [#allocation4], %s1272_s12  ;;  %v301_v60 = vld [vmem:[#allocation7 + $0x14] sm:$0x1] }
  0x68   : > { %177 = vst [vmem:[%s1278_s17 + $0x2] sm:$0x1] %v176_v10  ;;  %v188_v14 = vld [vmem:[%s187_s28] sm:$0x1]  ;;  %s1293_s29 = sld [smem:[#allocation3 + %s220_s26]]  ;;  %s194_s10 = scalar_lea.vmem [#allocation4], %s1274_s14 }
  0x69   : > { %184 = vst [vmem:[%s1278_s17 + $0x3] sm:$0x1] %v183_v11  ;;  %v190_v15 = vadd.f32 %v189_v12, %v188_v14  ;;  %v195_v16 = vld [vmem:[%s194_s10] sm:$0x1]  ;;  %s227_s13 = sadd.s32 10, %s1262_s11  ;;  %s234_s15 = sadd.s32 11, %s1262_s11 }
  0x6a   : > { %v197_v17 = vadd.f32 %v196_v13, %v195_v16  ;;  %s1298_s8 = sld [smem:[#allocation3 + %s227_s13]]  ;;  %s201_s12 = scalar_lea.vmem [#allocation4], %s1281_s20  ;;  %v308_v61 = vld [vmem:[#allocation7 + $0x15] sm:$0x1]  ;;  %v315_v2 = vld [vmem:[#allocation7 + $0x16] sm:$0x1] }
  0x6b   : > { %s1300_s16 = sld [smem:[#allocation3 + %s234_s15]]  ;;  %191 = vst [vmem:[%s1278_s17 + $0x4] sm:$0x1] %v190_v15  ;;  %v202_v21 = vld [vmem:[%s201_s12] sm:$0x1]  ;;  %s208_s14 = scalar_lea.vmem [#allocation4], %s1283_s21 }
  0x6c   : > { %198 = vst [vmem:[%s1278_s17 + $0x5] sm:$0x1] %v197_v17  ;;  %v209_v22 = vld [vmem:[%s208_s14] sm:$0x1]  ;;  %s241_s6 = sadd.s32 12, %s1262_s11  ;;  %s248_s18 = sadd.s32 13, %s1262_s11  ;;  %v204_v23 = vadd.f32 %v203_v18, %v202_v21 }
  0x6d   : > { %v211_v24 = vadd.f32 %v210_v19, %v209_v22  ;;  %s1308_s19 = sld [smem:[#allocation3 + %s241_s6]]  ;;  %s215_s26 = scalar_lea.vmem [#allocation4], %s1288_s7  ;;  %v322_v3 = vld [vmem:[#allocation7 + $0x17] sm:$0x1]  ;;  %v329_v4 = vld [vmem:[#allocation7 + $0x18] sm:$0x1] }
  0x6e   : > { %v216_v26 = vld [vmem:[%s215_s26] sm:$0x1]  ;;  %s1311_s20 = sld [smem:[#allocation3 + %s248_s18]]  ;;  %205 = vst [vmem:[%s1278_s17 + $0x6] sm:$0x1] %v204_v23  ;;  %s222_s21 = scalar_lea.vmem [#allocation4], %s1293_s29 }
  0x6f   : > { %212 = vst [vmem:[%s1278_s17 + $0x7] sm:$0x1] %v211_v24  ;;  %v218_v28 = vadd.f32 %v217_v20, %v216_v26  ;;  %v223_v29 = vld [vmem:[%s222_s21] sm:$0x1]  ;;  %s255_s28 = sadd.s32 14, %s1262_s11  ;;  %s262_s10 = sadd.s32 15, %s1262_s11 }
  0x70   : > { %v225_v31 = vadd.f32 %v224_v25, %v223_v29  ;;  %s229_s7 = scalar_lea.vmem [#allocation4], %s1298_s8  ;;  %s1321_s15 = sld [smem:[#allocation3 + %s255_s28]]  ;;  %v336_v9 = vld [vmem:[#allocation7 + $0x19] sm:$0x1]  ;;  %v343_v11 = vld [vmem:[#allocation7 + $0x1a] sm:$0x1] }
  0x71   : > { %219 = vst [vmem:[%s1278_s17 + $0x8] sm:$0x1] %v218_v28  ;;  %v230_v32 = vld [vmem:[%s229_s7] sm:$0x1]  ;;  %s236_s13 = scalar_lea.vmem [#allocation4], %s1300_s16  ;;  %s1323_s12 = sld [smem:[#allocation3 + %s262_s10]] }
  0x72   : > { %v237_v33 = vld [vmem:[%s236_s13] sm:$0x1]  ;;  %226 = vst [vmem:[%s1278_s17 + $0x9] sm:$0x1] %v225_v31  ;;  %v232_v34 = vadd.f32 %v231_v27, %v230_v32  ;;  %s269_s29 = sadd.s32 16, %s1262_s11  ;;  %s276_s14 = sadd.s32 17, %s1262_s11 }
  0x73   : > { %v239_v35 = vadd.f32 %v238_v30, %v237_v33  ;;  %s1328_s6 = sld [smem:[#allocation3 + %s269_s29]]  ;;  %s243_s8 = scalar_lea.vmem [#allocation4], %s1308_s19  ;;  %v350_v14 = vld [vmem:[#allocation7 + $0x1b] sm:$0x1]  ;;  %v357_v20 = vld [vmem:[#allocation7 + $0x1c] sm:$0x1] }
  0x74   : > { %233 = vst [vmem:[%s1278_s17 + $0xa] sm:$0x1] %v232_v34  ;;  %v244_v38 = vld [vmem:[%s243_s8] sm:$0x1]  ;;  %s1333_s16 = sld [smem:[#allocation3 + %s276_s14]]  ;;  %s250_s18 = scalar_lea.vmem [#allocation4], %s1311_s20 }
  0x75   : > { %240 = vst [vmem:[%s1278_s17 + $0xb] sm:$0x1] %v239_v35  ;;  %v246_v39 = vadd.f32 %v245_v36, %v244_v38  ;;  %v251_v40 = vld [vmem:[%s250_s18] sm:$0x1]  ;;  %s283_s26 = sadd.s32 18, %s1262_s11  ;;  %s290_s21 = sadd.s32 19, %s1262_s11 }
  0x76   : > { %v253_v41 = vadd.f32 %v252_v37, %v251_v40  ;;  %s1338_s28 = sld [smem:[#allocation3 + %s283_s26]]  ;;  %s257_s19 = scalar_lea.vmem [#allocation4], %s1321_s15  ;;  %v364_v21 = vld [vmem:[#allocation7 + $0x1d] sm:$0x1]  ;;  %v371_v26 = vld [vmem:[#allocation7 + $0x1e] sm:$0x1] }
  0x77   : > { %s1340_s10 = sld [smem:[#allocation3 + %s290_s21]]  ;;  %247 = vst [vmem:[%s1278_s17 + $0xc] sm:$0x1] %v246_v39  ;;  %v258_v45 = vld [vmem:[%s257_s19] sm:$0x1]  ;;  %s264_s20 = scalar_lea.vmem [#allocation4], %s1323_s12 }
  0x78   : > { %254 = vst [vmem:[%s1278_s17 + $0xd] sm:$0x1] %v253_v41  ;;  %v265_v46 = vld [vmem:[%s264_s20] sm:$0x1]  ;;  %s297_s7 = sadd.s32 20, %s1262_s11  ;;  %s304_s13 = sadd.s32 21, %s1262_s11  ;;  %v260_v47 = vadd.f32 %v259_v42, %v258_v45 }
  0x79   : > { %v267_v48 = vadd.f32 %v266_v43, %v265_v46  ;;  %s1348_s29 = sld [smem:[#allocation3 + %s297_s7]]  ;;  %s271_s14 = scalar_lea.vmem [#allocation4], %s1328_s6  ;;  %v378_v27 = vld [vmem:[#allocation7 + $0x1f] sm:$0x1]  ;;  %v385_v28 = vld [vmem:[#allocation7 + $0x20] sm:$0x1] }
  0x7a   : > { %v272_v50 = vld [vmem:[%s271_s14] sm:$0x1]  ;;  %s1351_s15 = sld [smem:[#allocation3 + %s304_s13]]  ;;  %261 = vst [vmem:[%s1278_s17 + $0xe] sm:$0x1] %v260_v47  ;;  %s278_s12 = scalar_lea.vmem [#allocation4], %s1333_s16 }
  0x7b   : > { %268 = vst [vmem:[%s1278_s17 + $0xf] sm:$0x1] %v267_v48  ;;  %v274_v52 = vadd.f32 %v273_v44, %v272_v50  ;;  %v279_v53 = vld [vmem:[%s278_s12] sm:$0x1]  ;;  %s311_s8 = sadd.s32 22, %s1262_s11  ;;  %s318_s18 = sadd.s32 23, %s1262_s11 }
  0x7c   : > { %v281_v55 = vadd.f32 %v280_v49, %v279_v53  ;;  %s285_s6 = scalar_lea.vmem [#allocation4], %s1338_s28  ;;  %s1361_s21 = sld [smem:[#allocation3 + %s311_s8]]  ;;  %v392_v33 = vld [vmem:[#allocation7 + $0x21] sm:$0x1]  ;;  %v399_v35 = vld [vmem:[#allocation7 + $0x22] sm:$0x1] }
  0x7d   : > { %275 = vst [vmem:[%s1278_s17 + $0x10] sm:$0x1] %v274_v52  ;;  %v286_v56 = vld [vmem:[%s285_s6] sm:$0x1]  ;;  %s292_s26 = scalar_lea.vmem [#allocation4], %s1340_s10  ;;  %s1363_s19 = sld [smem:[#allocation3 + %s318_s18]] }
  0x7e   : > { %v293_v57 = vld [vmem:[%s292_s26] sm:$0x1]  ;;  %282 = vst [vmem:[%s1278_s17 + $0x11] sm:$0x1] %v281_v55  ;;  %v288_v58 = vadd.f32 %v287_v51, %v286_v56  ;;  %s325_s16 = sadd.s32 24, %s1262_s11  ;;  %s332_s20 = sadd.s32 25, %s1262_s11 }
  0x7f   : > { %v295_v59 = vadd.f32 %v294_v54, %v293_v57  ;;  %s1368_s7 = sld [smem:[#allocation3 + %s325_s16]]  ;;  %s299_s28 = scalar_lea.vmem [#allocation4], %s1348_s29  ;;  %v406_v38 = vld [vmem:[#allocation7 + $0x23] sm:$0x1]  ;;  %v413_v44 = vld [vmem:[#allocation7 + $0x24] sm:$0x1] }
  0x80   : > { %289 = vst [vmem:[%s1278_s17 + $0x12] sm:$0x1] %v288_v58  ;;  %v300_v62 = vld [vmem:[%s299_s28] sm:$0x1]  ;;  %s1373_s10 = sld [smem:[#allocation3 + %s332_s20]]  ;;  %s306_s13 = scalar_lea.vmem [#allocation4], %s1351_s15 }
  0x81   : > { %296 = vst [vmem:[%s1278_s17 + $0x13] sm:$0x1] %v295_v59  ;;  %v302_v63 = vadd.f32 %v301_v60, %v300_v62  ;;  %v307_v0 = vld [vmem:[%s306_s13] sm:$0x1]  ;;  %s339_s14 = sadd.s32 26, %s1262_s11  ;;  %s346_s12 = sadd.s32 27, %s1262_s11 }
  0x82   : > { %v309_v1 = vadd.f32 %v308_v61, %v307_v0  ;;  %s1378_s8 = sld [smem:[#allocation3 + %s339_s14]]  ;;  %s313_s29 = scalar_lea.vmem [#allocation4], %s1361_s21  ;;  %v420_v45 = vld [vmem:[#allocation7 + $0x25] sm:$0x1]  ;;  %v427_v50 = vld [vmem:[#allocation7 + $0x26] sm:$0x1] }
  0x83   : > { %s1380_s18 = sld [smem:[#allocation3 + %s346_s12]]  ;;  %303 = vst [vmem:[%s1278_s17 + $0x14] sm:$0x1] %v302_v63  ;;  %v314_v5 = vld [vmem:[%s313_s29] sm:$0x1]  ;;  %s320_s15 = scalar_lea.vmem [#allocation4], %s1363_s19 }
  0x84   : > { %310 = vst [vmem:[%s1278_s17 + $0x15] sm:$0x1] %v309_v1  ;;  %v321_v6 = vld [vmem:[%s320_s15] sm:$0x1]  ;;  %s353_s6 = sadd.s32 28, %s1262_s11  ;;  %s360_s26 = sadd.s32 29, %s1262_s11  ;;  %v316_v7 = vadd.f32 %v315_v2, %v314_v5 }
  0x85   : > { %v323_v8 = vadd.f32 %v322_v3, %v321_v6  ;;  %s1388_s16 = sld [smem:[#allocation3 + %s353_s6]]  ;;  %s327_s20 = scalar_lea.vmem [#allocation4], %s1368_s7  ;;  %v434_v51 = vld [vmem:[#allocation7 + $0x27] sm:$0x1]  ;;  %v441_v52 = vld [vmem:[#allocation7 + $0x28] sm:$0x1] }
  0x86   : > { %v328_v10 = vld [vmem:[%s327_s20] sm:$0x1]  ;;  %s1391_s21 = sld [smem:[#allocation3 + %s360_s26]]  ;;  %317 = vst [vmem:[%s1278_s17 + $0x16] sm:$0x1] %v316_v7  ;;  %s334_s19 = scalar_lea.vmem [#allocation4], %s1373_s10 }
  0x87   : > { %324 = vst [vmem:[%s1278_s17 + $0x17] sm:$0x1] %v323_v8  ;;  %v330_v12 = vadd.f32 %v329_v4, %v328_v10  ;;  %v335_v13 = vld [vmem:[%s334_s19] sm:$0x1]  ;;  %s367_s28 = sadd.s32 30, %s1262_s11  ;;  %s374_s13 = sadd.s32 31, %s1262_s11 }
  0x88   : > { %v337_v15 = vadd.f32 %v336_v9, %v335_v13  ;;  %s341_s7 = scalar_lea.vmem [#allocation4], %s1378_s8  ;;  %s1401_s12 = sld [smem:[#allocation3 + %s367_s28]]  ;;  %v448_v57 = vld [vmem:[#allocation7 + $0x29] sm:$0x1]  ;;  %v455_v59 = vld [vmem:[#allocation7 + $0x2a] sm:$0x1] }
  0x89   : > { %331 = vst [vmem:[%s1278_s17 + $0x18] sm:$0x1] %v330_v12  ;;  %v342_v16 = vld [vmem:[%s341_s7] sm:$0x1]  ;;  %s348_s14 = scalar_lea.vmem [#allocation4], %s1380_s18  ;;  %s1403_s29 = sld [smem:[#allocation3 + %s374_s13]] }
  0x8a   : > { %v349_v17 = vld [vmem:[%s348_s14] sm:$0x1]  ;;  %338 = vst [vmem:[%s1278_s17 + $0x19] sm:$0x1] %v337_v15  ;;  %v344_v18 = vadd.f32 %v343_v11, %v342_v16  ;;  %s381_s10 = sadd.s32 32, %s1262_s11  ;;  %s388_s15 = sadd.s32 33, %s1262_s11 }
  0x8b   : > { %v351_v19 = vadd.f32 %v350_v14, %v349_v17  ;;  %s1408_s6 = sld [smem:[#allocation3 + %s381_s10]]  ;;  %s355_s8 = scalar_lea.vmem [#allocation4], %s1388_s16  ;;  %v462_v62 = vld [vmem:[#allocation7 + $0x2b] sm:$0x1]  ;;  %v469_v4 = vld [vmem:[#allocation7 + $0x2c] sm:$0x1] }
  0x8c   : > { %345 = vst [vmem:[%s1278_s17 + $0x1a] sm:$0x1] %v344_v18  ;;  %v356_v22 = vld [vmem:[%s355_s8] sm:$0x1]  ;;  %s1413_s18 = sld [smem:[#allocation3 + %s388_s15]]  ;;  %s362_s26 = scalar_lea.vmem [#allocation4], %s1391_s21 }
  0x8d   : > { %352 = vst [vmem:[%s1278_s17 + $0x1b] sm:$0x1] %v351_v19  ;;  %v358_v23 = vadd.f32 %v357_v20, %v356_v22  ;;  %v363_v24 = vld [vmem:[%s362_s26] sm:$0x1]  ;;  %s395_s20 = sadd.s32 34, %s1262_s11  ;;  %s402_s19 = sadd.s32 35, %s1262_s11 }
  0x8e   : > { %v365_v25 = vadd.f32 %v364_v21, %v363_v24  ;;  %s1418_s28 = sld [smem:[#allocation3 + %s395_s20]]  ;;  %s369_s16 = scalar_lea.vmem [#allocation4], %s1401_s12  ;;  %v476_v5 = vld [vmem:[#allocation7 + $0x2d] sm:$0x1]  ;;  %v483_v10 = vld [vmem:[#allocation7 + $0x2e] sm:$0x1] }
  0x8f   : > { %s1420_s13 = sld [smem:[#allocation3 + %s402_s19]]  ;;  %359 = vst [vmem:[%s1278_s17 + $0x1c] sm:$0x1] %v358_v23  ;;  %v370_v29 = vld [vmem:[%s369_s16] sm:$0x1]  ;;  %s376_s21 = scalar_lea.vmem [#allocation4], %s1403_s29 }
  0x90   : > { %366 = vst [vmem:[%s1278_s17 + $0x1d] sm:$0x1] %v365_v25  ;;  %v377_v30 = vld [vmem:[%s376_s21] sm:$0x1]  ;;  %s409_s7 = sadd.s32 36, %s1262_s11  ;;  %s416_s14 = sadd.s32 37, %s1262_s11  ;;  %v372_v31 = vadd.f32 %v371_v26, %v370_v29 }
  0x91   : > { %v379_v32 = vadd.f32 %v378_v27, %v377_v30  ;;  %s1428_s10 = sld [smem:[#allocation3 + %s409_s7]]  ;;  %s383_s15 = scalar_lea.vmem [#allocation4], %s1408_s6  ;;  %v490_v11 = vld [vmem:[#allocation7 + $0x2f] sm:$0x1]  ;;  %v497_v12 = vld [vmem:[#allocation7 + $0x30] sm:$0x1] }
  0x92   : > { %v384_v34 = vld [vmem:[%s383_s15] sm:$0x1]  ;;  %s1431_s12 = sld [smem:[#allocation3 + %s416_s14]]  ;;  %373 = vst [vmem:[%s1278_s17 + $0x1e] sm:$0x1] %v372_v31  ;;  %s390_s29 = scalar_lea.vmem [#allocation4], %s1413_s18 }
  0x93   : > { %380 = vst [vmem:[%s1278_s17 + $0x1f] sm:$0x1] %v379_v32  ;;  %v386_v36 = vadd.f32 %v385_v28, %v384_v34  ;;  %v391_v37 = vld [vmem:[%s390_s29] sm:$0x1]  ;;  %s423_s8 = sadd.s32 38, %s1262_s11  ;;  %s430_s26 = sadd.s32 39, %s1262_s11 }
  0x94   : > { %v393_v39 = vadd.f32 %v392_v33, %v391_v37  ;;  %s397_s6 = scalar_lea.vmem [#allocation4], %s1418_s28  ;;  %s1441_s19 = sld [smem:[#allocation3 + %s423_s8]]  ;;  %v504_v17 = vld [vmem:[#allocation7 + $0x31] sm:$0x1]  ;;  %v511_v19 = vld [vmem:[#allocation7 + $0x32] sm:$0x1] }
  0x95   : > { %387 = vst [vmem:[%s1278_s17 + $0x20] sm:$0x1] %v386_v36  ;;  %v398_v40 = vld [vmem:[%s397_s6] sm:$0x1]  ;;  %s404_s20 = scalar_lea.vmem [#allocation4], %s1420_s13  ;;  %s1443_s16 = sld [smem:[#allocation3 + %s430_s26]] }
  0x96   : > { %v405_v41 = vld [vmem:[%s404_s20] sm:$0x1]  ;;  %394 = vst [vmem:[%s1278_s17 + $0x21] sm:$0x1] %v393_v39  ;;  %v400_v42 = vadd.f32 %v399_v35, %v398_v40  ;;  %s437_s18 = sadd.s32 40, %s1262_s11  ;;  %s444_s21 = sadd.s32 41, %s1262_s11 }
  0x97   : > { %v407_v43 = vadd.f32 %v406_v38, %v405_v41  ;;  %s1448_s7 = sld [smem:[#allocation3 + %s437_s18]]  ;;  %s411_s28 = scalar_lea.vmem [#allocation4], %s1428_s10  ;;  %v518_v22 = vld [vmem:[#allocation7 + $0x33] sm:$0x1]  ;;  %v525_v28 = vld [vmem:[#allocation7 + $0x34] sm:$0x1] }
  0x98   : > { %401 = vst [vmem:[%s1278_s17 + $0x22] sm:$0x1] %v400_v42  ;;  %v412_v46 = vld [vmem:[%s411_s28] sm:$0x1]  ;;  %s1453_s13 = sld [smem:[#allocation3 + %s444_s21]]  ;;  %s418_s14 = scalar_lea.vmem [#allocation4], %s1431_s12 }
  0x99   : > { %408 = vst [vmem:[%s1278_s17 + $0x23] sm:$0x1] %v407_v43  ;;  %v414_v47 = vadd.f32 %v413_v44, %v412_v46  ;;  %v419_v48 = vld [vmem:[%s418_s14] sm:$0x1]  ;;  %s451_s15 = sadd.s32 42, %s1262_s11  ;;  %s458_s29 = sadd.s32 43, %s1262_s11 }
  0x9a   : > { %v421_v49 = vadd.f32 %v420_v45, %v419_v48  ;;  %s1458_s8 = sld [smem:[#allocation3 + %s451_s15]]  ;;  %s425_s10 = scalar_lea.vmem [#allocation4], %s1441_s19  ;;  %v532_v29 = vld [vmem:[#allocation7 + $0x35] sm:$0x1]  ;;  %v539_v34 = vld [vmem:[#allocation7 + $0x36] sm:$0x1] }
  0x9b   : > { %s1460_s26 = sld [smem:[#allocation3 + %s458_s29]]  ;;  %415 = vst [vmem:[%s1278_s17 + $0x24] sm:$0x1] %v414_v47  ;;  %v426_v53 = vld [vmem:[%s425_s10] sm:$0x1]  ;;  %s432_s12 = scalar_lea.vmem [#allocation4], %s1443_s16 }
  0x9c   : > { %422 = vst [vmem:[%s1278_s17 + $0x25] sm:$0x1] %v421_v49  ;;  %v433_v54 = vld [vmem:[%s432_s12] sm:$0x1]  ;;  %s465_s6 = sadd.s32 44, %s1262_s11  ;;  %s472_s20 = sadd.s32 45, %s1262_s11  ;;  %v428_v55 = vadd.f32 %v427_v50, %v426_v53 }
  0x9d   : > { %v435_v56 = vadd.f32 %v434_v51, %v433_v54  ;;  %s1468_s18 = sld [smem:[#allocation3 + %s465_s6]]  ;;  %s439_s21 = scalar_lea.vmem [#allocation4], %s1448_s7  ;;  %v546_v35 = vld [vmem:[#allocation7 + $0x37] sm:$0x1]  ;;  %v553_v36 = vld [vmem:[#allocation7 + $0x38] sm:$0x1] }
  0x9e   : > { %v440_v58 = vld [vmem:[%s439_s21] sm:$0x1]  ;;  %s1471_s19 = sld [smem:[#allocation3 + %s472_s20]]  ;;  %429 = vst [vmem:[%s1278_s17 + $0x26] sm:$0x1] %v428_v55  ;;  %s446_s16 = scalar_lea.vmem [#allocation4], %s1453_s13 }
  0x9f   : > { %436 = vst [vmem:[%s1278_s17 + $0x27] sm:$0x1] %v435_v56  ;;  %v442_v60 = vadd.f32 %v441_v52, %v440_v58  ;;  %v447_v61 = vld [vmem:[%s446_s16] sm:$0x1]  ;;  %s479_s28 = sadd.s32 46, %s1262_s11  ;;  %s486_s14 = sadd.s32 47, %s1262_s11 }
  0xa0   : > { %v449_v63 = vadd.f32 %v448_v57, %v447_v61  ;;  %s453_s7 = scalar_lea.vmem [#allocation4], %s1458_s8  ;;  %s1481_s29 = sld [smem:[#allocation3 + %s479_s28]]  ;;  %v560_v41 = vld [vmem:[#allocation7 + $0x39] sm:$0x1]  ;;  %v567_v43 = vld [vmem:[#allocation7 + $0x3a] sm:$0x1] }
  0xa1   : > { %443 = vst [vmem:[%s1278_s17 + $0x28] sm:$0x1] %v442_v60  ;;  %v454_v0 = vld [vmem:[%s453_s7] sm:$0x1]  ;;  %s460_s15 = scalar_lea.vmem [#allocation4], %s1460_s26  ;;  %s1483_s10 = sld [smem:[#allocation3 + %s486_s14]] }
  0xa2   : > { %v461_v1 = vld [vmem:[%s460_s15] sm:$0x1]  ;;  %450 = vst [vmem:[%s1278_s17 + $0x29] sm:$0x1] %v449_v63  ;;  %v456_v2 = vadd.f32 %v455_v59, %v454_v0  ;;  %s493_s13 = sadd.s32 48, %s1262_s11  ;;  %s500_s12 = sadd.s32 49, %s1262_s11 }
  0xa3   : > { %v463_v3 = vadd.f32 %v462_v62, %v461_v1  ;;  %s1488_s6 = sld [smem:[#allocation3 + %s493_s13]]  ;;  %s467_s8 = scalar_lea.vmem [#allocation4], %s1468_s18  ;;  %v574_v46 = vld [vmem:[#allocation7 + $0x3b] sm:$0x1]  ;;  %v581_v52 = vld [vmem:[#allocation7 + $0x3c] sm:$0x1] }
  0xa4   : > { %457 = vst [vmem:[%s1278_s17 + $0x2a] sm:$0x1] %v456_v2  ;;  %v468_v6 = vld [vmem:[%s467_s8] sm:$0x1]  ;;  %s1493_s26 = sld [smem:[#allocation3 + %s500_s12]]  ;;  %s474_s20 = scalar_lea.vmem [#allocation4], %s1471_s19 }
  0xa5   : > { %464 = vst [vmem:[%s1278_s17 + $0x2b] sm:$0x1] %v463_v3  ;;  %v470_v7 = vadd.f32 %v469_v4, %v468_v6  ;;  %v475_v8 = vld [vmem:[%s474_s20] sm:$0x1]  ;;  %s507_s21 = sadd.s32 50, %s1262_s11  ;;  %s514_s16 = sadd.s32 51, %s1262_s11 }
  0xa6   : > { %v477_v9 = vadd.f32 %v476_v5, %v475_v8  ;;  %s1498_s28 = sld [smem:[#allocation3 + %s507_s21]]  ;;  %s481_s18 = scalar_lea.vmem [#allocation4], %s1481_s29  ;;  %v588_v53 = vld [vmem:[#allocation7 + $0x3d] sm:$0x1]  ;;  %v595_v58 = vld [vmem:[#allocation7 + $0x3e] sm:$0x1] }
  0xa7   : > { %s1500_s14 = sld [smem:[#allocation3 + %s514_s16]]  ;;  %471 = vst [vmem:[%s1278_s17 + $0x2c] sm:$0x1] %v470_v7  ;;  %v482_v13 = vld [vmem:[%s481_s18] sm:$0x1]  ;;  %s488_s19 = scalar_lea.vmem [#allocation4], %s1483_s10 }
  0xa8   : > { %478 = vst [vmem:[%s1278_s17 + $0x2d] sm:$0x1] %v477_v9  ;;  %v489_v14 = vld [vmem:[%s488_s19] sm:$0x1]  ;;  %s521_s7 = sadd.s32 52, %s1262_s11  ;;  %s528_s15 = sadd.s32 53, %s1262_s11  ;;  %v484_v15 = vadd.f32 %v483_v10, %v482_v13 }
  0xa9   : > { %v491_v16 = vadd.f32 %v490_v11, %v489_v14  ;;  %s1508_s13 = sld [smem:[#allocation3 + %s521_s7]]  ;;  %s495_s12 = scalar_lea.vmem [#allocation4], %s1488_s6  ;;  %v602_v59 = vld [vmem:[#allocation7 + $0x3f] sm:$0x1]  ;;  %v609_v60 = vld [vmem:[#allocation7 + $0x40] sm:$0x1] }
  0xaa   : > { %v496_v18 = vld [vmem:[%s495_s12] sm:$0x1]  ;;  %s1511_s29 = sld [smem:[#allocation3 + %s528_s15]]  ;;  %485 = vst [vmem:[%s1278_s17 + $0x2e] sm:$0x1] %v484_v15  ;;  %s502_s10 = scalar_lea.vmem [#allocation4], %s1493_s26 }
  0xab   : > { %492 = vst [vmem:[%s1278_s17 + $0x2f] sm:$0x1] %v491_v16  ;;  %v498_v20 = vadd.f32 %v497_v12, %v496_v18  ;;  %v503_v21 = vld [vmem:[%s502_s10] sm:$0x1]  ;;  %s535_s8 = sadd.s32 54, %s1262_s11  ;;  %s542_s20 = sadd.s32 55, %s1262_s11 }
  0xac   : > { %v505_v23 = vadd.f32 %v504_v17, %v503_v21  ;;  %s509_s6 = scalar_lea.vmem [#allocation4], %s1498_s28  ;;  %s1521_s16 = sld [smem:[#allocation3 + %s535_s8]]  ;;  %v616_v1 = vld [vmem:[#allocation7 + $0x41] sm:$0x1]  ;;  %v623_v3 = vld [vmem:[#allocation7 + $0x42] sm:$0x1] }
  0xad   : > { %499 = vst [vmem:[%s1278_s17 + $0x30] sm:$0x1] %v498_v20  ;;  %v510_v24 = vld [vmem:[%s509_s6] sm:$0x1]  ;;  %s516_s21 = scalar_lea.vmem [#allocation4], %s1500_s14  ;;  %s1523_s18 = sld [smem:[#allocation3 + %s542_s20]] }
  0xae   : > { %v517_v25 = vld [vmem:[%s516_s21] sm:$0x1]  ;;  %506 = vst [vmem:[%s1278_s17 + $0x31] sm:$0x1] %v505_v23  ;;  %v512_v26 = vadd.f32 %v511_v19, %v510_v24  ;;  %s549_s26 = sadd.s32 56, %s1262_s11  ;;  %s556_s19 = sadd.s32 57, %s1262_s11 }
  0xaf   : > { %v519_v27 = vadd.f32 %v518_v22, %v517_v25  ;;  %s1528_s7 = sld [smem:[#allocation3 + %s549_s26]]  ;;  %s523_s28 = scalar_lea.vmem [#allocation4], %s1508_s13  ;;  %v630_v6 = vld [vmem:[#allocation7 + $0x43] sm:$0x1]  ;;  %v637_v12 = vld [vmem:[#allocation7 + $0x44] sm:$0x1] }
  0xb0   : > { %513 = vst [vmem:[%s1278_s17 + $0x32] sm:$0x1] %v512_v26  ;;  %v524_v30 = vld [vmem:[%s523_s28] sm:$0x1]  ;;  %s1533_s14 = sld [smem:[#allocation3 + %s556_s19]]  ;;  %s530_s15 = scalar_lea.vmem [#allocation4], %s1511_s29 }
  0xb1   : > { %520 = vst [vmem:[%s1278_s17 + $0x33] sm:$0x1] %v519_v27  ;;  %v526_v31 = vadd.f32 %v525_v28, %v524_v30  ;;  %v531_v32 = vld [vmem:[%s530_s15] sm:$0x1]  ;;  %s563_s12 = sadd.s32 58, %s1262_s11  ;;  %s570_s10 = sadd.s32 59, %s1262_s11 }
  0xb2   : > { %v533_v33 = vadd.f32 %v532_v29, %v531_v32  ;;  %s1538_s8 = sld [smem:[#allocation3 + %s563_s12]]  ;;  %s537_s13 = scalar_lea.vmem [#allocation4], %s1521_s16  ;;  %v644_v13 = vld [vmem:[#allocation7 + $0x45] sm:$0x1]  ;;  %v651_v18 = vld [vmem:[#allocation7 + $0x46] sm:$0x1] }
  0xb3   : > { %s1540_s20 = sld [smem:[#allocation3 + %s570_s10]]  ;;  %527 = vst [vmem:[%s1278_s17 + $0x34] sm:$0x1] %v526_v31  ;;  %v538_v37 = vld [vmem:[%s537_s13] sm:$0x1]  ;;  %s544_s29 = scalar_lea.vmem [#allocation4], %s1523_s18 }
  0xb4   : > { %534 = vst [vmem:[%s1278_s17 + $0x35] sm:$0x1] %v533_v33  ;;  %v545_v38 = vld [vmem:[%s544_s29] sm:$0x1]  ;;  %s577_s6 = sadd.s32 60, %s1262_s11  ;;  %s584_s21 = sadd.s32 61, %s1262_s11  ;;  %v540_v39 = vadd.f32 %v539_v34, %v538_v37 }
  0xb5   : > { %v547_v40 = vadd.f32 %v546_v35, %v545_v38  ;;  %s1548_s26 = sld [smem:[#allocation3 + %s577_s6]]  ;;  %s551_s19 = scalar_lea.vmem [#allocation4], %s1528_s7  ;;  %v658_v19 = vld [vmem:[#allocation7 + $0x47] sm:$0x1]  ;;  %v665_v20 = vld [vmem:[#allocation7 + $0x48] sm:$0x1] }
  0xb6   : > { %v552_v42 = vld [vmem:[%s551_s19] sm:$0x1]  ;;  %s1551_s16 = sld [smem:[#allocation3 + %s584_s21]]  ;;  %541 = vst [vmem:[%s1278_s17 + $0x36] sm:$0x1] %v540_v39  ;;  %s558_s18 = scalar_lea.vmem [#allocation4], %s1533_s14 }
  0xb7   : > { %548 = vst [vmem:[%s1278_s17 + $0x37] sm:$0x1] %v547_v40  ;;  %v554_v44 = vadd.f32 %v553_v36, %v552_v42  ;;  %v559_v45 = vld [vmem:[%s558_s18] sm:$0x1]  ;;  %s591_s28 = sadd.s32 62, %s1262_s11  ;;  %s598_s15 = sadd.s32 63, %s1262_s11 }
  0xb8   : > { %v561_v47 = vadd.f32 %v560_v41, %v559_v45  ;;  %s565_s7 = scalar_lea.vmem [#allocation4], %s1538_s8  ;;  %s1561_s10 = sld [smem:[#allocation3 + %s591_s28]]  ;;  %v672_v25 = vld [vmem:[#allocation7 + $0x49] sm:$0x1]  ;;  %v679_v27 = vld [vmem:[#allocation7 + $0x4a] sm:$0x1] }
  0xb9   : > { %555 = vst [vmem:[%s1278_s17 + $0x38] sm:$0x1] %v554_v44  ;;  %v566_v48 = vld [vmem:[%s565_s7] sm:$0x1]  ;;  %s572_s12 = scalar_lea.vmem [#allocation4], %s1540_s20  ;;  %s1563_s13 = sld [smem:[#allocation3 + %s598_s15]] }
  0xba   : > { %v573_v49 = vld [vmem:[%s572_s12] sm:$0x1]  ;;  %562 = vst [vmem:[%s1278_s17 + $0x39] sm:$0x1] %v561_v47  ;;  %v568_v50 = vadd.f32 %v567_v43, %v566_v48  ;;  %s605_s14 = sadd.s32 64, %s1262_s11  ;;  %s612_s29 = sadd.s32 65, %s1262_s11 }
  0xbb   : > { %v575_v51 = vadd.f32 %v574_v46, %v573_v49  ;;  %s1568_s6 = sld [smem:[#allocation3 + %s605_s14]]  ;;  %s579_s8 = scalar_lea.vmem [#allocation4], %s1548_s26  ;;  %v686_v30 = vld [vmem:[#allocation7 + $0x4b] sm:$0x1]  ;;  %v693_v36 = vld [vmem:[#allocation7 + $0x4c] sm:$0x1] }
  0xbc   : > { %569 = vst [vmem:[%s1278_s17 + $0x3a] sm:$0x1] %v568_v50  ;;  %v580_v54 = vld [vmem:[%s579_s8] sm:$0x1]  ;;  %s1573_s20 = sld [smem:[#allocation3 + %s612_s29]]  ;;  %s586_s21 = scalar_lea.vmem [#allocation4], %s1551_s16 }
  0xbd   : > { %576 = vst [vmem:[%s1278_s17 + $0x3b] sm:$0x1] %v575_v51  ;;  %v582_v55 = vadd.f32 %v581_v52, %v580_v54  ;;  %v587_v56 = vld [vmem:[%s586_s21] sm:$0x1]  ;;  %s619_s19 = sadd.s32 66, %s1262_s11  ;;  %s626_s18 = sadd.s32 67, %s1262_s11 }
  0xbe   : > { %v589_v57 = vadd.f32 %v588_v53, %v587_v56  ;;  %s1578_s28 = sld [smem:[#allocation3 + %s619_s19]]  ;;  %s593_s26 = scalar_lea.vmem [#allocation4], %s1561_s10  ;;  %v700_v37 = vld [vmem:[#allocation7 + $0x4d] sm:$0x1]  ;;  %v707_v42 = vld [vmem:[#allocation7 + $0x4e] sm:$0x1] }
  0xbf   : > { %s1580_s15 = sld [smem:[#allocation3 + %s626_s18]]  ;;  %583 = vst [vmem:[%s1278_s17 + $0x3c] sm:$0x1] %v582_v55  ;;  %v594_v61 = vld [vmem:[%s593_s26] sm:$0x1]  ;;  %s600_s16 = scalar_lea.vmem [#allocation4], %s1563_s13 }
  0xc0   : > { %590 = vst [vmem:[%s1278_s17 + $0x3d] sm:$0x1] %v589_v57  ;;  %v601_v62 = vld [vmem:[%s600_s16] sm:$0x1]  ;;  %s633_s7 = sadd.s32 68, %s1262_s11  ;;  %s640_s12 = sadd.s32 69, %s1262_s11  ;;  %v596_v63 = vadd.f32 %v595_v58, %v594_v61 }
  0xc1   : > { %v603_v0 = vadd.f32 %v602_v59, %v601_v62  ;;  %s1588_s14 = sld [smem:[#allocation3 + %s633_s7]]  ;;  %s607_s29 = scalar_lea.vmem [#allocation4], %s1568_s6  ;;  %v714_v43 = vld [vmem:[#allocation7 + $0x4f] sm:$0x1] }
  0xc2   : > { %v608_v2 = vld [vmem:[%s607_s29] sm:$0x1]  ;;  %s1591_s10 = sld [smem:[#allocation3 + %s640_s12]]  ;;  %597 = vst [vmem:[%s1278_s17 + $0x3e] sm:$0x1] %v596_v63  ;;  %s614_s13 = scalar_lea.vmem [#allocation4], %s1573_s20 }
  0xc3   : > { %604 = vst [vmem:[%s1278_s17 + $0x3f] sm:$0x1] %v603_v0  ;;  %v610_v4 = vadd.f32 %v609_v60, %v608_v2  ;;  %v615_v5 = vld [vmem:[%s614_s13] sm:$0x1]  ;;  %s647_s8 = sadd.s32 70, %s1262_s11  ;;  %s654_s21 = sadd.s32 71, %s1262_s11 }
  0xc4   : > { %v617_v7 = vadd.f32 %v616_v1, %v615_v5  ;;  %s621_s6 = scalar_lea.vmem [#allocation4], %s1578_s28  ;;  %s1601_s18 = sld [smem:[#allocation3 + %s647_s8]] }
  0xc5   : > { %611 = vst [vmem:[%s1278_s17 + $0x40] sm:$0x1] %v610_v4  ;;  %v622_v8 = vld [vmem:[%s621_s6] sm:$0x1]  ;;  %s628_s19 = scalar_lea.vmem [#allocation4], %s1580_s15  ;;  %s1603_s26 = sld [smem:[#allocation3 + %s654_s21]] }
  0xc6   : > { %v629_v9 = vld [vmem:[%s628_s19] sm:$0x1]  ;;  %618 = vst [vmem:[%s1278_s17 + $0x41] sm:$0x1] %v617_v7  ;;  %v624_v10 = vadd.f32 %v623_v3, %v622_v8  ;;  %s661_s20 = sadd.s32 72, %s1262_s11  ;;  %s668_s16 = sadd.s32 73, %s1262_s11 }
  0xc7   : > { %v631_v11 = vadd.f32 %v630_v6, %v629_v9  ;;  %s1608_s7 = sld [smem:[#allocation3 + %s661_s20]]  ;;  %s635_s28 = scalar_lea.vmem [#allocation4], %s1588_s14 }
  0xc8   : > { %625 = vst [vmem:[%s1278_s17 + $0x42] sm:$0x1] %v624_v10  ;;  %v636_v14 = vld [vmem:[%s635_s28] sm:$0x1]  ;;  %s1613_s15 = sld [smem:[#allocation3 + %s668_s16]]  ;;  %s642_s12 = scalar_lea.vmem [#allocation4], %s1591_s10 }
  0xc9   : > { %632 = vst [vmem:[%s1278_s17 + $0x43] sm:$0x1] %v631_v11  ;;  %v638_v15 = vadd.f32 %v637_v12, %v636_v14  ;;  %v643_v16 = vld [vmem:[%s642_s12] sm:$0x1]  ;;  %s675_s29 = sadd.s32 74, %s1262_s11  ;;  %s682_s13 = sadd.s32 75, %s1262_s11 }
  0xca   : > { %v645_v17 = vadd.f32 %v644_v13, %v643_v16  ;;  %s1618_s8 = sld [smem:[#allocation3 + %s675_s29]]  ;;  %s649_s14 = scalar_lea.vmem [#allocation4], %s1601_s18 }
  0xcb   : > { %s1620_s21 = sld [smem:[#allocation3 + %s682_s13]]  ;;  %639 = vst [vmem:[%s1278_s17 + $0x44] sm:$0x1] %v638_v15  ;;  %v650_v21 = vld [vmem:[%s649_s14] sm:$0x1]  ;;  %s656_s10 = scalar_lea.vmem [#allocation4], %s1603_s26 }
  0xcc   : > { %646 = vst [vmem:[%s1278_s17 + $0x45] sm:$0x1] %v645_v17  ;;  %v657_v22 = vld [vmem:[%s656_s10] sm:$0x1]  ;;  %s689_s6 = sadd.s32 76, %s1262_s11  ;;  %s696_s19 = sadd.s32 77, %s1262_s11  ;;  %v652_v23 = vadd.f32 %v651_v18, %v650_v21 }
  0xcd   : > { %v659_v24 = vadd.f32 %v658_v19, %v657_v22  ;;  %s1628_s20 = sld [smem:[#allocation3 + %s689_s6]]  ;;  %s663_s16 = scalar_lea.vmem [#allocation4], %s1608_s7 }
  0xce   : > { %v664_v26 = vld [vmem:[%s663_s16] sm:$0x1]  ;;  %s1631_s18 = sld [smem:[#allocation3 + %s696_s19]]  ;;  %653 = vst [vmem:[%s1278_s17 + $0x46] sm:$0x1] %v652_v23  ;;  %s670_s26 = scalar_lea.vmem [#allocation4], %s1613_s15 }
  0xcf   : > { %660 = vst [vmem:[%s1278_s17 + $0x47] sm:$0x1] %v659_v24  ;;  %v666_v28 = vadd.f32 %v665_v20, %v664_v26  ;;  %v671_v29 = vld [vmem:[%s670_s26] sm:$0x1]  ;;  %s703_s28 = sadd.s32 78, %s1262_s11  ;;  %s710_s12 = sadd.s32 79, %s1262_s11 }
  0xd0   : > { %v673_v31 = vadd.f32 %v672_v25, %v671_v29  ;;  %s677_s7 = scalar_lea.vmem [#allocation4], %s1618_s8  ;;  %s704_s13 = sld [smem:[#allocation3 + %s703_s28]] }
  0xd1   : > { %667 = vst [vmem:[%s1278_s17 + $0x48] sm:$0x1] %v666_v28  ;;  %v678_v32 = vld [vmem:[%s677_s7] sm:$0x1]  ;;  %s684_s29 = scalar_lea.vmem [#allocation4], %s1620_s21  ;;  %s711_s14 = sld [smem:[#allocation3 + %s710_s12]] }
  0xd2   : > { %v685_v33 = vld [vmem:[%s684_s29] sm:$0x1]  ;;  %674 = vst [vmem:[%s1278_s17 + $0x49] sm:$0x1] %v673_v31  ;;  %v680_v34 = vadd.f32 %v679_v27, %v678_v32  ;;  %s894_s15 = smul.u32 1280, %s1161_s0  ;;  %s731_s21 = sshll.u32 %s1278_s17, 4  ;;  %s1655_s21 = int_to_ptr.vmem [resolvable:$true] %s731_s21 }
  0xd3   : > { %v687_v35 = vadd.f32 %v686_v30, %v685_v33  ;;  %s691_s11 = scalar_lea.vmem [#allocation4], %s1628_s20  ;;  %s1661_s16 = scalar_lea.sflag [#allocation6], %s154_s9 }
  0xd4   : > { %681 = vst [vmem:[%s1278_s17 + $0x4a] sm:$0x1] %v680_v34  ;;  %v692_v38 = vld [vmem:[%s691_s11] sm:$0x1]  ;;  %s698_s8 = scalar_lea.vmem [#allocation4], %s1631_s18  ;;  %s1653_s0 = scalar_lea.hbm %s1705_s3, %s894_s15 }
  0xd5   : > { %688 = vst [vmem:[%s1278_s17 + $0x4b] sm:$0x1] %v687_v35  ;;  %v694_v39 = vadd.f32 %v693_v36, %v692_v38  ;;  %v699_v40 = vld [vmem:[%s698_s8] sm:$0x1]  ;;  %s1026_s18 = scalar_lea.vmem %s1655_s21, 1280  ;;  %s1105_s26 = smov [#allocation9]  }
  0xd6   : > { %v701_v41 = vadd.f32 %v700_v37, %v699_v40  ;;  %s705_s10 = scalar_lea.vmem [#allocation4], %s704_s13  ;;  %p1027_p1 = scmp.ne.s32.totalorder %s1655_s21, %s1026_s18 }
  0xd7   : > { %695 = vst [vmem:[%s1278_s17 + $0x4c] sm:$0x1] %v694_v39  ;;  %v706_v44 = vld [vmem:[%s705_s10] sm:$0x1]  ;;  %s712_s6 = scalar_lea.vmem [#allocation4], %s711_s14  ;;  %s1030_s28 = sshll.u32 %s1105_s26, 4  ;;  %s1031_s28 = int_to_ptr.vmem [resolvable:$false] %s1030_s28 }
  0xd8   : > { %702 = vst [vmem:[%s1278_s17 + $0x4d] sm:$0x1] %v701_v41  ;;  %v713_v45 = vld [vmem:[%s712_s6] sm:$0x1]  ;;  %v708_v46 = vadd.f32 %v707_v42, %v706_v44  ;;  %p1028_p4 = pnand %p1027_p1, %p1718_p13  ;;  %s1032_s12 = scalar_lea.vmem %s1031_s28, 2560 }
  0xd9   : > { %v715_v47 = vadd.f32 %v714_v43, %v713_v45  ;;  %p1033_p6 = scmp.lt.s32.totalorder %s1655_s21, %s1031_s28  ;;  %p1034_p7 = scmp.lt.s32.totalorder %s1032_s12, %s1026_s18 }
  0xda   : > { %709 = vst [vmem:[%s1278_s17 + $0x4e] sm:$0x1] %v708_v46  ;;  %p1029_p5 = pneg %p1028_p4 }
  0xdb   : > { %716 = vst [vmem:[%s1278_s17 + $0x4f] sm:$0x1] %v715_v47  ;;  %p1035_p10 = por %p1034_p7, %p1033_p6 }
  0xdd   : > { %p1036_p11 = pnand %p1035_p10, %p1029_p5 }
  0xdf   : > { %1039 = shalt.err (!%p1036_p11)
}
  0xe0   : > { %s1040_s9 = scalar_lea.hbm %s1653_s0, 1280  ;;  %s1044_s29 = scalar_lea.hbm %s1705_s3, 2560 }
  0xe1   : > { %p1041_p0 = scmp.ne.s32.totalorder %s1653_s0, %s1040_s9  ;;  %p1045_p3 = scmp.lt.u32.totalorder %s1653_s0, %s1705_s3 }
  0xe2   : > { %p1046_p9 = scmp.lt.u32.totalorder %s1044_s29, %s1040_s9  ;;  %p1048_p1 = scmp.lt.u32.totalorder %s1040_s9, %s1653_s0 }
  0xe3   : > { %p1042_p2 = pnand %p1041_p0, %p1718_p13 }
  0xe4   : > { %p1047_p12 = por %p1046_p9, %p1045_p3 }
  0xe5   : > { %p1043_p8 = pneg %p1042_p2 }
  0xe6   : > { %p1049_p4 = por %p1048_p1, %p1047_p12 }
  0xe8   : > { %p1050_p5 = pnand %p1049_p4, %p1043_p8 }
  0xea   : > { %1053 = shalt.err (!%p1050_p5)
}
  0xeb   : > { %s1106_s11 = smov 128   ;;  %s1107_s15 = smov 8  }
  0xec   : > { %903 = dma.vmem_to_hbm [thread:$0]  (%p1718_p13), %s1655_s21, 1280, %s1653_s0, %s1661_s16, %s1106_s11, %s1106_s11, %s1107_s15  }
  0xed PF: > { %p920_p6 = scmp.ge.s32.totalorder %s1098_s25, 2  ;;  %s746_s8 = sand.u32 1, %s1086_s22  }
  0xee   : > { %p1719_p7 = scmp.ne.s32.totalorder %s1710_s5, 0  ;;  %s747_s10 = scalar_lea.sflag [#allocation6], %s746_s8 }
  0xf0   : > { %p913_p10 = pnand %p920_p6, %p1719_p7 }
  0xf2   : > { %1081 = dma.done.wait (!%p913_p10), %s747_s10, 1280  }
  0xf3   : > { %1083 = vsyncadd (!%p913_p10), %s747_s10, 4294966016  ;;  %p19_p11 = scmp.ge.s32.totalorder %s1165_s27, 4   ;;  %s1720_s22 = smov %s1090_s23 }
  0xf4   : > { %s1721_s23 = smov %s1094_s24  ;;  %s1722_s24 = smov %s1176_s30 }
  0xf5   : > { %s1723_s25 = smov %s1165_s27  ;;  %21 = sbr.rel (!%p19_p11) target bundleno = 17 (0x11), region = 149 }
  0xfc   :  { %752 = vsyncpa [#allocation5], 1 }
  0xfd   :  { %754 = vsyncpa [#allocation5 + $0x1], 1 }
  0xfe   :  { %755 = vsyncpa [#allocation8], 1 }
  0xff   :  { %756 = vsyncpa [#allocation6], 1 }
 0x100   :  { %758 = vsyncpa [#allocation6 + $0x1], 1 }

</bundles_post_ra>
